<compile_context>
chip_gen: v5e
topology: v5e:2x2
jax: 0.10.0
libtpu: 0.0.40
codegen_flags: <defaults>
</compile_context>

<pallas_src>
from functools import partial

import jax
import jax.numpy as jnp
from jax.experimental import pallas as pl
from jax.experimental.pallas import tpu as pltpu

C_IN_P = 24    # conv1 input channels, 20 padded to 24
C_MID_P = 16   # conv1/conv3 output channels (10/12), padded to 16
C_3X3_P = 24   # conv2/conv4 output channels (22), padded to 24
GUARD = 128    # lane-tile-aligned guard bands of the 3x3 staging buffer


# ---------------------------------------------------------------------------
# Fused kernel: conv1 .. conv6 for one batch element, everything in VMEM.
# Activations live channels-first over the padded-flat spatial axis
# q = (i+1)*Wp + (j+1) (zero halo ring), padded to L_PAD lanes, so 3x3 taps
# are plain lane-window shifts of a zero-guarded VMEM staging buffer.
# ---------------------------------------------------------------------------
def _fused_convnet_kernel(mask_ref, x_ref, w1_ref, b1m_ref, w2_ref, w3_ref,
                          b3m_ref, w4_ref, w56_ref, b56_ref, o_ref,
                          stage_ref, *, wp, l_pad, guard):
    # 3x3 tap offsets in padded-flat coordinates (|off| <= wp+1 < guard).
    offs = [(dh - 1) * wp + (dw - 1) for dh in range(3) for dw in range(3)]
    c_stage = stage_ref.shape[0]

    # Zero only the guard bands; the interior is fully overwritten below.
    zeros_guard = jnp.zeros((c_stage, guard), jnp.float32)
    stage_ref[:, :guard] = zeros_guard
    stage_ref[:, guard + l_pad:] = zeros_guard

    x = x_ref[0]                  # (24, L_PAD): channels-first, padded-flat

    def conv3x3(w_ref):
        # Nine shifted (Cout,16)@(16,L_PAD) MXU dots, f32 accumulation.
        # No tap-staging buffer: reads the guarded stage windows directly.
        acc = None
        for t, off in enumerate(offs):
            win = stage_ref[:, guard + off:guard + off + l_pad]
            term = jnp.dot(w_ref[t], win, preferred_element_type=jnp.float32)
            acc = term if acc is None else acc + term
        return acc                # (24, L_PAD); halo/pad lanes are garbage

    # conv1: 1x1 (20->10) + bias (bias pre-masked -> halo/pad stay zero)
    v1 = (jnp.dot(w1_ref[...], x, preferred_element_type=jnp.float32)
          + b1m_ref[...])                                  # (16, L_PAD)
    stage_ref[:, guard:guard + l_pad] = v1                 # aligned, unmasked
    # conv2: 3x3 (10->22), no bias
    v2 = conv3x3(w2_ref)                                   # (24, L_PAD)
    # conv3: 1x1 (22->12) + bias; mask re-zeroes halo/pad lanes for conv4
    v3 = (jnp.dot(w3_ref[...], v2, preferred_element_type=jnp.float32)
          + b3m_ref[...]) * mask_ref[...]                  # (16, L_PAD)
    stage_ref[:, guard:guard + l_pad] = v3
    # conv4: 3x3 (12->22), no bias (halo garbage never read back)
    v4 = conv3x3(w4_ref)                                   # (24, L_PAD)
    # conv5 o conv6 folded into a single 1x1 (22->1) + bias
    out = (jnp.dot(w56_ref[...], v4, preferred_element_type=jnp.float32)
           + b56_ref[...])                                 # (1, L_PAD)
    o_ref[...] = out[None].astype(o_ref.dtype)


# ---------------------------------------------------------------------------
# Wrapper
# ---------------------------------------------------------------------------
@jax.jit
def forward(x_nchw, prep):
    n, c, h, w = x_nchw.shape
    assert c == 20, c
    hp, wp = h + 2, w + 2
    assert wp + 1 <= GUARD
    l = hp * wp
    l_pad = pl.cdiv(l, 128) * 128
    w_stage = GUARD + l_pad + GUARD

    # One-time layout prep in XLA: pad channels 20->24, spatial halo of 1,
    # flatten spatial -> channels-first padded-flat (N, 24, L_PAD).
    xp = jnp.pad(x_nchw, ((0, 0), (0, C_IN_P - c), (1, 1), (1, 1)))
    xp = xp.reshape(n, C_IN_P, l)
    xp = jnp.pad(xp, ((0, 0), (0, 0), (0, l_pad - l)))

    # Interior mask in padded-flat coordinates (0 on halo ring and lane pad).
    mask = jnp.pad(jnp.ones((h, w), jnp.float32),
                   ((1, 1), (1, 1))).reshape(1, l)
    mask = jnp.pad(mask, ((0, 0), (0, l_pad - l)))

    # Hoist bias*mask out of the kernel (constant, resident inputs).
    b1m = prep["b1"] * mask                                # (16, L_PAD)
    b3m = prep["b3"] * mask                                # (16, L_PAD)

    def full(shape):
        return pl.BlockSpec(shape, lambda b: (0,) * len(shape))

    out_flat = pl.pallas_call(
        partial(_fused_convnet_kernel, wp=wp, l_pad=l_pad, guard=GUARD),
        out_shape=jax.ShapeDtypeStruct((n, 1, l_pad), x_nchw.dtype),
        grid=(n,),
        in_specs=[
            full((1, l_pad)),                                    # mask
            pl.BlockSpec((1, C_IN_P, l_pad), lambda b: (b, 0, 0)),  # x
            full((C_MID_P, C_IN_P)),                             # w1
            full((C_MID_P, l_pad)),                              # b1*mask
            full((9, C_3X3_P, C_MID_P)),                         # w2 (per tap)
            full((C_MID_P, C_3X3_P)),                            # w3
            full((C_MID_P, l_pad)),                              # b3*mask
            full((9, C_3X3_P, C_MID_P)),                         # w4 (per tap)
            full((1, C_3X3_P)),                                  # w5*w6 folded
            full((1, 1)),                                        # folded bias
        ],
        out_specs=pl.BlockSpec((1, 1, l_pad), lambda b: (b, 0, 0)),
        scratch_shapes=[
            pltpu.VMEM((C_MID_P, w_stage), jnp.float32),         # guarded stage
        ],
        compiler_params=pltpu.CompilerParams(
            dimension_semantics=("parallel",)),
    )(mask, xp, prep["w1"], b1m, prep["w2"], prep["w3"], b3m,
      prep["w4"], prep["w56"], prep["b56"])

    # Drop the lane pad, then the interior of the padded image -> NCHW.
    return out_flat[:, :, :l].reshape(n, 1, hp, wp)[:, :, 1:-1, 1:-1]


# ---------------------------------------------------------------------------
# Parameters (PyTorch-natural layout) + kernel-friendly repacking
# ---------------------------------------------------------------------------
def init_params(key):
    """Init mimicking PyTorch Conv2d defaults (uniform +-1/sqrt(fan_in))."""
    def uinit(k, shape, fan_in):
        bound = 1.0 / (fan_in ** 0.5)
        return jax.random.uniform(k, shape, jnp.float32, -bound, bound)

    ks = jax.random.split(key, 10)
    return {
        "w1": uinit(ks[0], (20, 10), 20),        "b1": uinit(ks[1], (10,), 20),
        "w2": uinit(ks[2], (9, 10, 22), 9 * 10),
        "w3": uinit(ks[3], (22, 12), 22),        "b3": uinit(ks[4], (12,), 22),
        "w4": uinit(ks[5], (9, 12, 22), 9 * 12),
        "w5": uinit(ks[6], (22, 384), 22),       "b5": uinit(ks[7], (384,), 22),
        "w6": uinit(ks[8], (384, 1), 384),       "b6": uinit(ks[9], (1,), 384),
    }


def prepare_params(p):
    """Repack to channels-first, channel-padded, per-tap MXU weights and
    algebraically fold conv5 o conv6 into one 1x1 conv (both 1x1, linear)."""
    w1 = jnp.zeros((C_MID_P, C_IN_P), jnp.float32).at[:10, :20].set(p["w1"].T)
    b1 = jnp.zeros((C_MID_P, 1), jnp.float32).at[:10, 0].set(p["b1"])
    w2 = jnp.zeros((9, C_3X3_P, C_MID_P), jnp.float32).at[:, :22, :10].set(
        jnp.transpose(p["w2"], (0, 2, 1)))
    w3 = jnp.zeros((C_MID_P, C_3X3_P), jnp.float32).at[:12, :22].set(p["w3"].T)
    b3 = jnp.zeros((C_MID_P, 1), jnp.float32).at[:12, 0].set(p["b3"])
    w4 = jnp.zeros((9, C_3X3_P, C_MID_P), jnp.float32).at[:, :22, :12].set(
        jnp.transpose(p["w4"], (0, 2, 1)))
    w56_full = p["w5"] @ p["w6"]                       # (22, 1)
    b56 = (p["b5"] @ p["w6"] + p["b6"]).reshape(1, 1)  # (1, 1)
    w56 = jnp.zeros((1, C_3X3_P), jnp.float32).at[0, :22].set(w56_full[:, 0])
    return {"w1": w1, "b1": b1, "w2": w2, "w3": w3, "b3": b3,
            "w4": w4, "w56": w56, "b56": b56}


# ---------------------------------------------------------------------------
# Pure-JAX reference (unfolded, matches the PyTorch module exactly)
# ---------------------------------------------------------------------------
def _ref_forward(x_nchw, params):
    def pw(x, w, b):
        return jnp.einsum("nchw,cd->ndhw", x, w) + b[None, :, None, None]

    def c3(x, w9):
        w = jnp.transpose(w9.reshape(3, 3, w9.shape[1], w9.shape[2]),
                          (3, 2, 0, 1))
        return jax.lax.conv_general_dilated(
            x, w, window_strides=(1, 1), padding=((1, 1), (1, 1)),
            dimension_numbers=("NCHW", "OIHW", "NCHW"))

    v1 = pw(x_nchw, params["w1"], params["b1"])
    v2 = c3(v1, params["w2"])
    v3 = pw(v2, params["w3"], params["b3"])
    v4 = c3(v3, params["w4"])
    v5 = pw(v4, params["w5"], params["b5"])
    v6 = pw(v5, params["w6"], params["b6"])
    return v6


if __name__ == "__main__":
    key = jax.random.PRNGKey(0)
    k_param, k_x = jax.random.split(key)
    params = init_params(k_param)
    prep = prepare_params(params)

    # Small input consistent with the module (input channels must be 20).
    x = jax.random.normal(k_x, (2, 20, 16, 16), dtype=jnp.float32)

    out = jax.block_until_ready(forward(x, prep))
    assert out.shape == (2, 1, 16, 16), out.shape

    ref = _ref_forward(x, params)
    err = float(jnp.max(jnp.abs(out - ref)))
    assert jnp.allclose(out, ref, atol=5e-3, rtol=5e-2), err

    print("KERNEL_OK")
</pallas_src>

<mosaic_0001>
module attributes {stable_mosaic.version = 11 : i64} {
  func.func @_fused_convnet_kernel(%arg0: i32, %arg1: memref<1x384xf32, #tpu.memory_space<vmem>>, %arg2: memref<1x24x384xf32, #tpu.memory_space<vmem>>, %arg3: memref<16x24xf32, #tpu.memory_space<vmem>>, %arg4: memref<16x384xf32, #tpu.memory_space<vmem>>, %arg5: memref<9x24x16xf32, #tpu.memory_space<vmem>>, %arg6: memref<16x24xf32, #tpu.memory_space<vmem>>, %arg7: memref<16x384xf32, #tpu.memory_space<vmem>>, %arg8: memref<9x24x16xf32, #tpu.memory_space<vmem>>, %arg9: memref<1x24xf32, #tpu.memory_space<vmem>>, %arg10: memref<1x1xf32, #tpu.memory_space<vmem>>, %arg11: memref<1x1x384xf32, #tpu.memory_space<vmem>>, %arg12: memref<16x640xf32, #tpu.memory_space<vmem>>) attributes {dimension_semantics = [#tpu.dimension_semantics<parallel>], iteration_bounds = array<i64: 2>, scalar_prefetch = 0 : i64, scratch_operands = 1 : i64, tpu.core_type = #tpu.core_type<tc>, window_params = [{pipeline_mode = #tpu.pipeline_mode<synchronous>, transform_indices = @transform_0, window_bounds = array<i64: 1, 384>}, {transform_indices = @transform_1, window_bounds = array<i64: 1, 24, 384>}, {pipeline_mode = #tpu.pipeline_mode<synchronous>, transform_indices = @transform_2, window_bounds = array<i64: 16, 24>}, {pipeline_mode = #tpu.pipeline_mode<synchronous>, transform_indices = @transform_3, window_bounds = array<i64: 16, 384>}, {pipeline_mode = #tpu.pipeline_mode<synchronous>, transform_indices = @transform_4, window_bounds = array<i64: 9, 24, 16>}, {pipeline_mode = #tpu.pipeline_mode<synchronous>, transform_indices = @transform_5, window_bounds = array<i64: 16, 24>}, {pipeline_mode = #tpu.pipeline_mode<synchronous>, transform_indices = @transform_6, window_bounds = array<i64: 16, 384>}, {pipeline_mode = #tpu.pipeline_mode<synchronous>, transform_indices = @transform_7, window_bounds = array<i64: 9, 24, 16>}, {pipeline_mode = #tpu.pipeline_mode<synchronous>, transform_indices = @transform_8, window_bounds = array<i64: 1, 24>}, {pipeline_mode = #tpu.pipeline_mode<synchronous>, transform_indices = @transform_9, window_bounds = array<i64: 1, 1>}, {transform_indices = @transform_10, window_bounds = array<i64: 1, 1, 384>}]} {
    %cst = arith.constant 0.000000e+00 : f32
    %0 = vector.broadcast %cst : f32 to vector<16x128xf32>
    %c0 = arith.constant 0 : index
    %c0_0 = arith.constant 0 : index
    %1 = vector.load %arg12[%c0, %c0_0] : memref<16x640xf32, #tpu.memory_space<vmem>>, vector<16x128xf32>
    tpu.vector_store %arg12[%c0, %c0_0], %0 {strides = array<i32>} : memref<16x640xf32, #tpu.memory_space<vmem>>, vector<16x128xf32>,
    %c0_1 = arith.constant 0 : index
    %c512 = arith.constant 512 : index
    %2 = vector.load %arg12[%c0_1, %c512] : memref<16x640xf32, #tpu.memory_space<vmem>>, vector<16x128xf32>
    tpu.vector_store %arg12[%c0_1, %c512], %0 {strides = array<i32>} : memref<16x640xf32, #tpu.memory_space<vmem>>, vector<16x128xf32>,
    %c0_2 = arith.constant 0 : index
    %c0_3 = arith.constant 0 : index
    %c0_4 = arith.constant 0 : index
    %3 = vector.load %arg2[%c0_2, %c0_3, %c0_4] : memref<1x24x384xf32, #tpu.memory_space<vmem>>, vector<1x24x384xf32>
    %4 = vector.shape_cast %3 : vector<1x24x384xf32> to vector<24x384xf32>
    %c0_5 = arith.constant 0 : index
    %c0_6 = arith.constant 0 : index
    %5 = vector.load %arg3[%c0_5, %c0_6] : memref<16x24xf32, #tpu.memory_space<vmem>>, vector<16x24xf32>
    %cst_7 = arith.constant dense<0.000000e+00> : vector<16x384xf32>
    %6 = tpu.matmul %5, %4, %cst_7 {dimension_numbers = #tpu.dot_dimension_numbers<[1], [0], [0], [1], [0, 0, 1, 1], [], []>} : vector<16x24xf32>, vector<24x384xf32>, vector<16x384xf32> -> vector<16x384xf32>
    %c0_8 = arith.constant 0 : index
    %c0_9 = arith.constant 0 : index
    %7 = vector.load %arg4[%c0_8, %c0_9] : memref<16x384xf32, #tpu.memory_space<vmem>>, vector<16x384xf32>
    %8 = arith.addf %6, %7 : vector<16x384xf32>
    %c0_10 = arith.constant 0 : index
    %c128 = arith.constant 128 : index
    %9 = vector.load %arg12[%c0_10, %c128] : memref<16x640xf32, #tpu.memory_space<vmem>>, vector<16x384xf32>
    tpu.vector_store %arg12[%c0_10, %c128], %8 {strides = array<i32>} : memref<16x640xf32, #tpu.memory_space<vmem>>, vector<16x384xf32>,
    %c0_11 = arith.constant 0 : index
    %c109 = arith.constant 109 : index
    %10 = vector.load %arg12[%c0_11, %c109] : memref<16x640xf32, #tpu.memory_space<vmem>>, vector<16x384xf32>
    %c0_12 = arith.constant 0 : index
    %c0_13 = arith.constant 0 : index
    %c0_14 = arith.constant 0 : index
    %11 = vector.load %arg5[%c0_12, %c0_13, %c0_14] : memref<9x24x16xf32, #tpu.memory_space<vmem>>, vector<1x24x16xf32>
    %12 = vector.shape_cast %11 : vector<1x24x16xf32> to vector<24x16xf32>
    %cst_15 = arith.constant dense<0.000000e+00> : vector<24x384xf32>
    %13 = tpu.matmul %12, %10, %cst_15 {dimension_numbers = #tpu.dot_dimension_numbers<[1], [0], [0], [1], [0, 0, 1, 1], [], []>} : vector<24x16xf32>, vector<16x384xf32>, vector<24x384xf32> -> vector<24x384xf32>
    %c0_16 = arith.constant 0 : index
    %c110 = arith.constant 110 : index
    %14 = vector.load %arg12[%c0_16, %c110] : memref<16x640xf32, #tpu.memory_space<vmem>>, vector<16x384xf32>
    %c1 = arith.constant 1 : index
    %c0_17 = arith.constant 0 : index
    %c0_18 = arith.constant 0 : index
    %15 = vector.load %arg5[%c1, %c0_17, %c0_18] : memref<9x24x16xf32, #tpu.memory_space<vmem>>, vector<1x24x16xf32>
    %16 = vector.shape_cast %15 : vector<1x24x16xf32> to vector<24x16xf32>
    %cst_19 = arith.constant dense<0.000000e+00> : vector<24x384xf32>
    %17 = tpu.matmul %16, %14, %cst_19 {dimension_numbers = #tpu.dot_dimension_numbers<[1], [0], [0], [1], [0, 0, 1, 1], [], []>} : vector<24x16xf32>, vector<16x384xf32>, vector<24x384xf32> -> vector<24x384xf32>
    %18 = arith.addf %13, %17 : vector<24x384xf32>
    %c0_20 = arith.constant 0 : index
    %c111 = arith.constant 111 : index
    %19 = vector.load %arg12[%c0_20, %c111] : memref<16x640xf32, #tpu.memory_space<vmem>>, vector<16x384xf32>
    %c2 = arith.constant 2 : index
    %c0_21 = arith.constant 0 : index
    %c0_22 = arith.constant 0 : index
    %20 = vector.load %arg5[%c2, %c0_21, %c0_22] : memref<9x24x16xf32, #tpu.memory_space<vmem>>, vector<1x24x16xf32>
    %21 = vector.shape_cast %20 : vector<1x24x16xf32> to vector<24x16xf32>
    %cst_23 = arith.constant dense<0.000000e+00> : vector<24x384xf32>
    %22 = tpu.matmul %21, %19, %cst_23 {dimension_numbers = #tpu.dot_dimension_numbers<[1], [0], [0], [1], [0, 0, 1, 1], [], []>} : vector<24x16xf32>, vector<16x384xf32>, vector<24x384xf32> -> vector<24x384xf32>
    %23 = arith.addf %18, %22 : vector<24x384xf32>
    %c0_24 = arith.constant 0 : index
    %c127 = arith.constant 127 : index
    %24 = vector.load %arg12[%c0_24, %c127] : memref<16x640xf32, #tpu.memory_space<vmem>>, vector<16x384xf32>
    %c3 = arith.constant 3 : index
    %c0_25 = arith.constant 0 : index
    %c0_26 = arith.constant 0 : index
    %25 = vector.load %arg5[%c3, %c0_25, %c0_26] : memref<9x24x16xf32, #tpu.memory_space<vmem>>, vector<1x24x16xf32>
    %26 = vector.shape_cast %25 : vector<1x24x16xf32> to vector<24x16xf32>
    %cst_27 = arith.constant dense<0.000000e+00> : vector<24x384xf32>
    %27 = tpu.matmul %26, %24, %cst_27 {dimension_numbers = #tpu.dot_dimension_numbers<[1], [0], [0], [1], [0, 0, 1, 1], [], []>} : vector<24x16xf32>, vector<16x384xf32>, vector<24x384xf32> -> vector<24x384xf32>
    %28 = arith.addf %23, %27 : vector<24x384xf32>
    %c0_28 = arith.constant 0 : index
    %c128_29 = arith.constant 128 : index
    %29 = vector.load %arg12[%c0_28, %c128_29] : memref<16x640xf32, #tpu.memory_space<vmem>>, vector<16x384xf32>
    %c4 = arith.constant 4 : index
    %c0_30 = arith.constant 0 : index
    %c0_31 = arith.constant 0 : index
    %30 = vector.load %arg5[%c4, %c0_30, %c0_31] : memref<9x24x16xf32, #tpu.memory_space<vmem>>, vector<1x24x16xf32>
    %31 = vector.shape_cast %30 : vector<1x24x16xf32> to vector<24x16xf32>
    %cst_32 = arith.constant dense<0.000000e+00> : vector<24x384xf32>
    %32 = tpu.matmul %31, %29, %cst_32 {dimension_numbers = #tpu.dot_dimension_numbers<[1], [0], [0], [1], [0, 0, 1, 1], [], []>} : vector<24x16xf32>, vector<16x384xf32>, vector<24x384xf32> -> vector<24x384xf32>
    %33 = arith.addf %28, %32 : vector<24x384xf32>
    %c0_33 = arith.constant 0 : index
    %c129 = arith.constant 129 : index
    %34 = vector.load %arg12[%c0_33, %c129] : memref<16x640xf32, #tpu.memory_space<vmem>>, vector<16x384xf32>
    %c5 = arith.constant 5 : index
    %c0_34 = arith.constant 0 : index
    %c0_35 = arith.constant 0 : index
    %35 = vector.load %arg5[%c5, %c0_34, %c0_35] : memref<9x24x16xf32, #tpu.memory_space<vmem>>, vector<1x24x16xf32>
    %36 = vector.shape_cast %35 : vector<1x24x16xf32> to vector<24x16xf32>
    %cst_36 = arith.constant dense<0.000000e+00> : vector<24x384xf32>
    %37 = tpu.matmul %36, %34, %cst_36 {dimension_numbers = #tpu.dot_dimension_numbers<[1], [0], [0], [1], [0, 0, 1, 1], [], []>} : vector<24x16xf32>, vector<16x384xf32>, vector<24x384xf32> -> vector<24x384xf32>
    %38 = arith.addf %33, %37 : vector<24x384xf32>
    %c0_37 = arith.constant 0 : index
    %c145 = arith.constant 145 : index
    %39 = vector.load %arg12[%c0_37, %c145] : memref<16x640xf32, #tpu.memory_space<vmem>>, vector<16x384xf32>
    %c6 = arith.constant 6 : index
    %c0_38 = arith.constant 0 : index
    %c0_39 = arith.constant 0 : index
    %40 = vector.load %arg5[%c6, %c0_38, %c0_39] : memref<9x24x16xf32, #tpu.memory_space<vmem>>, vector<1x24x16xf32>
    %41 = vector.shape_cast %40 : vector<1x24x16xf32> to vector<24x16xf32>
    %cst_40 = arith.constant dense<0.000000e+00> : vector<24x384xf32>
    %42 = tpu.matmul %41, %39, %cst_40 {dimension_numbers = #tpu.dot_dimension_numbers<[1], [0], [0], [1], [0, 0, 1, 1], [], []>} : vector<24x16xf32>, vector<16x384xf32>, vector<24x384xf32> -> vector<24x384xf32>
    %43 = arith.addf %38, %42 : vector<24x384xf32>
    %c0_41 = arith.constant 0 : index
    %c146 = arith.constant 146 : index
    %44 = vector.load %arg12[%c0_41, %c146] : memref<16x640xf32, #tpu.memory_space<vmem>>, vector<16x384xf32>
    %c7 = arith.constant 7 : index
    %c0_42 = arith.constant 0 : index
    %c0_43 = arith.constant 0 : index
    %45 = vector.load %arg5[%c7, %c0_42, %c0_43] : memref<9x24x16xf32, #tpu.memory_space<vmem>>, vector<1x24x16xf32>
    %46 = vector.shape_cast %45 : vector<1x24x16xf32> to vector<24x16xf32>
    %cst_44 = arith.constant dense<0.000000e+00> : vector<24x384xf32>
    %47 = tpu.matmul %46, %44, %cst_44 {dimension_numbers = #tpu.dot_dimension_numbers<[1], [0], [0], [1], [0, 0, 1, 1], [], []>} : vector<24x16xf32>, vector<16x384xf32>, vector<24x384xf32> -> vector<24x384xf32>
    %48 = arith.addf %43, %47 : vector<24x384xf32>
    %c0_45 = arith.constant 0 : index
    %c147 = arith.constant 147 : index
    %49 = vector.load %arg12[%c0_45, %c147] : memref<16x640xf32, #tpu.memory_space<vmem>>, vector<16x384xf32>
    %c8 = arith.constant 8 : index
    %c0_46 = arith.constant 0 : index
    %c0_47 = arith.constant 0 : index
    %50 = vector.load %arg5[%c8, %c0_46, %c0_47] : memref<9x24x16xf32, #tpu.memory_space<vmem>>, vector<1x24x16xf32>
    %51 = vector.shape_cast %50 : vector<1x24x16xf32> to vector<24x16xf32>
    %cst_48 = arith.constant dense<0.000000e+00> : vector<24x384xf32>
    %52 = tpu.matmul %51, %49, %cst_48 {dimension_numbers = #tpu.dot_dimension_numbers<[1], [0], [0], [1], [0, 0, 1, 1], [], []>} : vector<24x16xf32>, vector<16x384xf32>, vector<24x384xf32> -> vector<24x384xf32>
    %53 = arith.addf %48, %52 : vector<24x384xf32>
    %c0_49 = arith.constant 0 : index
    %c0_50 = arith.constant 0 : index
    %54 = vector.load %arg6[%c0_49, %c0_50] : memref<16x24xf32, #tpu.memory_space<vmem>>, vector<16x24xf32>
    %cst_51 = arith.constant dense<0.000000e+00> : vector<16x384xf32>
    %55 = tpu.matmul %54, %53, %cst_51 {dimension_numbers = #tpu.dot_dimension_numbers<[1], [0], [0], [1], [0, 0, 1, 1], [], []>} : vector<16x24xf32>, vector<24x384xf32>, vector<16x384xf32> -> vector<16x384xf32>
    %c0_52 = arith.constant 0 : index
    %c0_53 = arith.constant 0 : index
    %56 = vector.load %arg7[%c0_52, %c0_53] : memref<16x384xf32, #tpu.memory_space<vmem>>, vector<16x384xf32>
    %57 = arith.addf %55, %56 : vector<16x384xf32>
    %c0_54 = arith.constant 0 : index
    %c0_55 = arith.constant 0 : index
    %58 = vector.load %arg1[%c0_54, %c0_55] : memref<1x384xf32, #tpu.memory_space<vmem>>, vector<1x384xf32>
    %59 = vector.broadcast %58 : vector<1x384xf32> to vector<16x384xf32>
    %60 = arith.mulf %57, %59 : vector<16x384xf32>
    %c0_56 = arith.constant 0 : index
    %c128_57 = arith.constant 128 : index
    %61 = vector.load %arg12[%c0_56, %c128_57] : memref<16x640xf32, #tpu.memory_space<vmem>>, vector<16x384xf32>
    tpu.vector_store %arg12[%c0_56, %c128_57], %60 {strides = array<i32>} : memref<16x640xf32, #tpu.memory_space<vmem>>, vector<16x384xf32>,
    %c0_58 = arith.constant 0 : index
    %c109_59 = arith.constant 109 : index
    %62 = vector.load %arg12[%c0_58, %c109_59] : memref<16x640xf32, #tpu.memory_space<vmem>>, vector<16x384xf32>
    %c0_60 = arith.constant 0 : index
    %c0_61 = arith.constant 0 : index
    %c0_62 = arith.constant 0 : index
    %63 = vector.load %arg8[%c0_60, %c0_61, %c0_62] : memref<9x24x16xf32, #tpu.memory_space<vmem>>, vector<1x24x16xf32>
    %64 = vector.shape_cast %63 : vector<1x24x16xf32> to vector<24x16xf32>
    %cst_63 = arith.constant dense<0.000000e+00> : vector<24x384xf32>
    %65 = tpu.matmul %64, %62, %cst_63 {dimension_numbers = #tpu.dot_dimension_numbers<[1], [0], [0], [1], [0, 0, 1, 1], [], []>} : vector<24x16xf32>, vector<16x384xf32>, vector<24x384xf32> -> vector<24x384xf32>
    %c0_64 = arith.constant 0 : index
    %c110_65 = arith.constant 110 : index
    %66 = vector.load %arg12[%c0_64, %c110_65] : memref<16x640xf32, #tpu.memory_space<vmem>>, vector<16x384xf32>
    %c1_66 = arith.constant 1 : index
    %c0_67 = arith.constant 0 : index
    %c0_68 = arith.constant 0 : index
    %67 = vector.load %arg8[%c1_66, %c0_67, %c0_68] : memref<9x24x16xf32, #tpu.memory_space<vmem>>, vector<1x24x16xf32>
    %68 = vector.shape_cast %67 : vector<1x24x16xf32> to vector<24x16xf32>
    %cst_69 = arith.constant dense<0.000000e+00> : vector<24x384xf32>
    %69 = tpu.matmul %68, %66, %cst_69 {dimension_numbers = #tpu.dot_dimension_numbers<[1], [0], [0], [1], [0, 0, 1, 1], [], []>} : vector<24x16xf32>, vector<16x384xf32>, vector<24x384xf32> -> vector<24x384xf32>
    %70 = arith.addf %65, %69 : vector<24x384xf32>
    %c0_70 = arith.constant 0 : index
    %c111_71 = arith.constant 111 : index
    %71 = vector.load %arg12[%c0_70, %c111_71] : memref<16x640xf32, #tpu.memory_space<vmem>>, vector<16x384xf32>
    %c2_72 = arith.constant 2 : index
    %c0_73 = arith.constant 0 : index
    %c0_74 = arith.constant 0 : index
    %72 = vector.load %arg8[%c2_72, %c0_73, %c0_74] : memref<9x24x16xf32, #tpu.memory_space<vmem>>, vector<1x24x16xf32>
    %73 = vector.shape_cast %72 : vector<1x24x16xf32> to vector<24x16xf32>
    %cst_75 = arith.constant dense<0.000000e+00> : vector<24x384xf32>
    %74 = tpu.matmul %73, %71, %cst_75 {dimension_numbers = #tpu.dot_dimension_numbers<[1], [0], [0], [1], [0, 0, 1, 1], [], []>} : vector<24x16xf32>, vector<16x384xf32>, vector<24x384xf32> -> vector<24x384xf32>
    %75 = arith.addf %70, %74 : vector<24x384xf32>
    %c0_76 = arith.constant 0 : index
    %c127_77 = arith.constant 127 : index
    %76 = vector.load %arg12[%c0_76, %c127_77] : memref<16x640xf32, #tpu.memory_space<vmem>>, vector<16x384xf32>
    %c3_78 = arith.constant 3 : index
    %c0_79 = arith.constant 0 : index
    %c0_80 = arith.constant 0 : index
    %77 = vector.load %arg8[%c3_78, %c0_79, %c0_80] : memref<9x24x16xf32, #tpu.memory_space<vmem>>, vector<1x24x16xf32>
    %78 = vector.shape_cast %77 : vector<1x24x16xf32> to vector<24x16xf32>
    %cst_81 = arith.constant dense<0.000000e+00> : vector<24x384xf32>
    %79 = tpu.matmul %78, %76, %cst_81 {dimension_numbers = #tpu.dot_dimension_numbers<[1], [0], [0], [1], [0, 0, 1, 1], [], []>} : vector<24x16xf32>, vector<16x384xf32>, vector<24x384xf32> -> vector<24x384xf32>
    %80 = arith.addf %75, %79 : vector<24x384xf32>
    %c0_82 = arith.constant 0 : index
    %c128_83 = arith.constant 128 : index
    %81 = vector.load %arg12[%c0_82, %c128_83] : memref<16x640xf32, #tpu.memory_space<vmem>>, vector<16x384xf32>
    %c4_84 = arith.constant 4 : index
    %c0_85 = arith.constant 0 : index
    %c0_86 = arith.constant 0 : index
    %82 = vector.load %arg8[%c4_84, %c0_85, %c0_86] : memref<9x24x16xf32, #tpu.memory_space<vmem>>, vector<1x24x16xf32>
    %83 = vector.shape_cast %82 : vector<1x24x16xf32> to vector<24x16xf32>
    %cst_87 = arith.constant dense<0.000000e+00> : vector<24x384xf32>
    %84 = tpu.matmul %83, %81, %cst_87 {dimension_numbers = #tpu.dot_dimension_numbers<[1], [0], [0], [1], [0, 0, 1, 1], [], []>} : vector<24x16xf32>, vector<16x384xf32>, vector<24x384xf32> -> vector<24x384xf32>
    %85 = arith.addf %80, %84 : vector<24x384xf32>
    %c0_88 = arith.constant 0 : index
    %c129_89 = arith.constant 129 : index
    %86 = vector.load %arg12[%c0_88, %c129_89] : memref<16x640xf32, #tpu.memory_space<vmem>>, vector<16x384xf32>
    %c5_90 = arith.constant 5 : index
    %c0_91 = arith.constant 0 : index
    %c0_92 = arith.constant 0 : index
    %87 = vector.load %arg8[%c5_90, %c0_91, %c0_92] : memref<9x24x16xf32, #tpu.memory_space<vmem>>, vector<1x24x16xf32>
    %88 = vector.shape_cast %87 : vector<1x24x16xf32> to vector<24x16xf32>
    %cst_93 = arith.constant dense<0.000000e+00> : vector<24x384xf32>
    %89 = tpu.matmul %88, %86, %cst_93 {dimension_numbers = #tpu.dot_dimension_numbers<[1], [0], [0], [1], [0, 0, 1, 1], [], []>} : vector<24x16xf32>, vector<16x384xf32>, vector<24x384xf32> -> vector<24x384xf32>
    %90 = arith.addf %85, %89 : vector<24x384xf32>
    %c0_94 = arith.constant 0 : index
    %c145_95 = arith.constant 145 : index
    %91 = vector.load %arg12[%c0_94, %c145_95] : memref<16x640xf32, #tpu.memory_space<vmem>>, vector<16x384xf32>
    %c6_96 = arith.constant 6 : index
    %c0_97 = arith.constant 0 : index
    %c0_98 = arith.constant 0 : index
    %92 = vector.load %arg8[%c6_96, %c0_97, %c0_98] : memref<9x24x16xf32, #tpu.memory_space<vmem>>, vector<1x24x16xf32>
    %93 = vector.shape_cast %92 : vector<1x24x16xf32> to vector<24x16xf32>
    %cst_99 = arith.constant dense<0.000000e+00> : vector<24x384xf32>
    %94 = tpu.matmul %93, %91, %cst_99 {dimension_numbers = #tpu.dot_dimension_numbers<[1], [0], [0], [1], [0, 0, 1, 1], [], []>} : vector<24x16xf32>, vector<16x384xf32>, vector<24x384xf32> -> vector<24x384xf32>
    %95 = arith.addf %90, %94 : vector<24x384xf32>
    %c0_100 = arith.constant 0 : index
    %c146_101 = arith.constant 146 : index
    %96 = vector.load %arg12[%c0_100, %c146_101] : memref<16x640xf32, #tpu.memory_space<vmem>>, vector<16x384xf32>
    %c7_102 = arith.constant 7 : index
    %c0_103 = arith.constant 0 : index
    %c0_104 = arith.constant 0 : index
    %97 = vector.load %arg8[%c7_102, %c0_103, %c0_104] : memref<9x24x16xf32, #tpu.memory_space<vmem>>, vector<1x24x16xf32>
    %98 = vector.shape_cast %97 : vector<1x24x16xf32> to vector<24x16xf32>
    %cst_105 = arith.constant dense<0.000000e+00> : vector<24x384xf32>
    %99 = tpu.matmul %98, %96, %cst_105 {dimension_numbers = #tpu.dot_dimension_numbers<[1], [0], [0], [1], [0, 0, 1, 1], [], []>} : vector<24x16xf32>, vector<16x384xf32>, vector<24x384xf32> -> vector<24x384xf32>
    %100 = arith.addf %95, %99 : vector<24x384xf32>
    %c0_106 = arith.constant 0 : index
    %c147_107 = arith.constant 147 : index
    %101 = vector.load %arg12[%c0_106, %c147_107] : memref<16x640xf32, #tpu.memory_space<vmem>>, vector<16x384xf32>
    %c8_108 = arith.constant 8 : index
    %c0_109 = arith.constant 0 : index
    %c0_110 = arith.constant 0 : index
    %102 = vector.load %arg8[%c8_108, %c0_109, %c0_110] : memref<9x24x16xf32, #tpu.memory_space<vmem>>, vector<1x24x16xf32>
    %103 = vector.shape_cast %102 : vector<1x24x16xf32> to vector<24x16xf32>
    %cst_111 = arith.constant dense<0.000000e+00> : vector<24x384xf32>
    %104 = tpu.matmul %103, %101, %cst_111 {dimension_numbers = #tpu.dot_dimension_numbers<[1], [0], [0], [1], [0, 0, 1, 1], [], []>} : vector<24x16xf32>, vector<16x384xf32>, vector<24x384xf32> -> vector<24x384xf32>
    %105 = arith.addf %100, %104 : vector<24x384xf32>
    %c0_112 = arith.constant 0 : index
    %c0_113 = arith.constant 0 : index
    %106 = vector.load %arg9[%c0_112, %c0_113] : memref<1x24xf32, #tpu.memory_space<vmem>>, vector<1x24xf32>
    %cst_114 = arith.constant dense<0.000000e+00> : vector<1x384xf32>
    %107 = tpu.matmul %106, %105, %cst_114 {dimension_numbers = #tpu.dot_dimension_numbers<[1], [0], [0], [1], [0, 0, 1, 1], [], []>} : vector<1x24xf32>, vector<24x384xf32>, vector<1x384xf32> -> vector<1x384xf32>
    %c0_115 = arith.constant 0 : index
    %c0_116 = arith.constant 0 : index
    %108 = vector.load %arg10[%c0_115, %c0_116] : memref<1x1xf32, #tpu.memory_space<vmem>>, vector<1x1xf32>
    %109 = vector.broadcast %108 : vector<1x1xf32> to vector<1x384xf32>
    %110 = arith.addf %107, %109 : vector<1x384xf32>
    %111 = vector.shape_cast %110 : vector<1x384xf32> to vector<1x1x384xf32>
    %c0_117 = arith.constant 0 : index
    %c0_118 = arith.constant 0 : index
    %c0_119 = arith.constant 0 : index
    %112 = vector.load %arg11[%c0_117, %c0_118, %c0_119] : memref<1x1x384xf32, #tpu.memory_space<vmem>>, vector<1x1x384xf32>
    tpu.vector_store %arg11[%c0_117, %c0_118, %c0_119], %111 {strides = array<i32>} : memref<1x1x384xf32, #tpu.memory_space<vmem>>, vector<1x1x384xf32>,
    return
  }
  func.func @transform_0(%arg0: i32) -> (i32, i32) {
    %c0_i32 = arith.constant 0 : i32
    %c0_i32_0 = arith.constant 0 : i32
    %c0_i32_1 = arith.constant 0 : i32
    return %c0_i32, %c0_i32_0 : i32, i32
  }
  func.func @transform_1(%arg0: i32) -> (i32, i32, i32) {
    %c0_i32 = arith.constant 0 : i32
    %c0_i32_0 = arith.constant 0 : i32
    %c0_i32_1 = arith.constant 0 : i32
    return %arg0, %c0_i32, %c0_i32_0 : i32, i32, i32
  }
  func.func @transform_2(%arg0: i32) -> (i32, i32) {
    %c0_i32 = arith.constant 0 : i32
    %c0_i32_0 = arith.constant 0 : i32
    %c0_i32_1 = arith.constant 0 : i32
    return %c0_i32, %c0_i32_0 : i32, i32
  }
  func.func @transform_3(%arg0: i32) -> (i32, i32) {
    %c0_i32 = arith.constant 0 : i32
    %c0_i32_0 = arith.constant 0 : i32
    %c0_i32_1 = arith.constant 0 : i32
    return %c0_i32, %c0_i32_0 : i32, i32
  }
  func.func @transform_4(%arg0: i32) -> (i32, i32, i32) {
    %c0_i32 = arith.constant 0 : i32
    %c0_i32_0 = arith.constant 0 : i32
    %c0_i32_1 = arith.constant 0 : i32
    %c0_i32_2 = arith.constant 0 : i32
    return %c0_i32, %c0_i32_0, %c0_i32_1 : i32, i32, i32
  }
  func.func @transform_5(%arg0: i32) -> (i32, i32) {
    %c0_i32 = arith.constant 0 : i32
    %c0_i32_0 = arith.constant 0 : i32
    %c0_i32_1 = arith.constant 0 : i32
    return %c0_i32, %c0_i32_0 : i32, i32
  }
  func.func @transform_6(%arg0: i32) -> (i32, i32) {
    %c0_i32 = arith.constant 0 : i32
    %c0_i32_0 = arith.constant 0 : i32
    %c0_i32_1 = arith.constant 0 : i32
    return %c0_i32, %c0_i32_0 : i32, i32
  }
  func.func @transform_7(%arg0: i32) -> (i32, i32, i32) {
    %c0_i32 = arith.constant 0 : i32
    %c0_i32_0 = arith.constant 0 : i32
    %c0_i32_1 = arith.constant 0 : i32
    %c0_i32_2 = arith.constant 0 : i32
    return %c0_i32, %c0_i32_0, %c0_i32_1 : i32, i32, i32
  }
  func.func @transform_8(%arg0: i32) -> (i32, i32) {
    %c0_i32 = arith.constant 0 : i32
    %c0_i32_0 = arith.constant 0 : i32
    %c0_i32_1 = arith.constant 0 : i32
    return %c0_i32, %c0_i32_0 : i32, i32
  }
  func.func @transform_9(%arg0: i32) -> (i32, i32) {
    %c0_i32 = arith.constant 0 : i32
    %c0_i32_0 = arith.constant 0 : i32
    %c0_i32_1 = arith.constant 0 : i32
    return %c0_i32, %c0_i32_0 : i32, i32
  }
  func.func @transform_10(%arg0: i32) -> (i32, i32, i32) {
    %c0_i32 = arith.constant 0 : i32
    %c0_i32_0 = arith.constant 0 : i32
    %c0_i32_1 = arith.constant 0 : i32
    return %arg0, %c0_i32, %c0_i32_0 : i32, i32, i32
  }
}

</mosaic_0001>

<bundles_post_ra>
// kernel: forward.1
= control target key start
LH: loop header
LB: loop body
LE: loop exit
PB: predicated region body
PF: predicated region fallthrough
CT: control target
= control target key end

     0   :  { %s3639_s15 = smov 0   ;;  %s4510_s0 = inlined_call_operand.vmem [shape: f32[1,384], index: 0, kind: input, shape index: {}]   ;;  %s4511_s1 = inlined_call_operand.vmem [shape: f32[2,24,384], index: 1, kind: input, shape index: {}]   ;;  %s4512_s2 = inlined_call_operand.vmem [shape: f32[16,24], index: 2, kind: input, shape index: {}]   ;;  %s4513_s3 = inlined_call_operand.vmem [shape: f32[16,384], index: 3, kind: input, shape index: {}]   ;;  %s4514_s4 = inlined_call_operand.vmem [shape: f32[9,24,16], index: 4, kind: input, shape index: {}]   ;;  %s4515_s5 = inlined_call_operand.vmem [shape: f32[16,24], index: 5, kind: input, shape index: {}]   ;;  %s4516_s6 = inlined_call_operand.vmem [shape: f32[16,384], index: 6, kind: input, shape index: {}]   ;;  %s4517_s7 = inlined_call_operand.vmem [shape: f32[9,24,16], index: 7, kind: input, shape index: {}]   ;;  %s4518_s8 = inlined_call_operand.vmem [shape: f32[1,24], index: 8, kind: input, shape index: {}]   ;;  %s4519_s9 = inlined_call_operand.<no memory space> [shape: f32[1,1], index: 9, kind: input, shape index: {}]   ;;  %s4520_s10 = inlined_call_operand.vmem [shape: f32[2,1,384], index: 10, kind: output, shape index: {}]  }
   0x1   :  { %v15_v0 = vstv %s4519_s9 }
   0x2   :  { %16 = vst [vmem:[#allocation3] sm:$0x1] %v15_v0 }
   0x3 LB: > { %s2988_s16 = sadd.s32 4294967295, %s3569_s15   ;;  %p2992_p0 = scmp.ge.s32.totalorder %s3569_s15, 1  ;;  %s3569_s15 = sphi %s3639_s15, %s22_s15  }
   0x4   : > { %p314_p1 = scmp.lt.s32.totalorder %s3569_s15, 3 }
   0x6   : > { %p315_p2 = pnand %p2992_p0, %p314_p1 }
   0x8   : > { %318 = sbr.rel (%p315_p2) target bundleno = 1307 (0x51b), region = 60 }
   0xd   : > { %p351_p3 = scmp.lt.s32.totalorder %s2988_s16, 1  ;;  %v373_v10 = vld [vmem:[%s4512_s2] sm:$0xff]  ;;  %vm381_vm0 = vcmask 195584   ;;  %v374_v11 = vld [vmem:[%s4512_s2 + $0x8] sm:$0xff]  ;;  %v378_v14 = vld [vmem:[%s4513_s3 + $0x18] sm:$0xff]  ;;  %v4521_v21 = vmov 0.0  }
   0xe   : > { %v379_v16 = vld [vmem:[%s4513_s3 + $0x20] sm:$0xff]  ;;  %v376_v25 = vld [vmem:[%s4513_s3 + $0x8] sm:$0xff]  ;;  %s3572_s12 = smov 18   ;;  %v377_v31 = vld [vmem:[%s4513_s3 + $0x10] sm:$0xff]  ;;  %s3575_s20 = smov 1   ;;  %vm502_vm1 = vcmask 146432  }
   0xf   : > { %s4561_s16 = smov (!%p351_p3, %s2988_s16), 1  ;;  %v375_v23 = vld [vmem:[%s4513_s3] sm:$0xff]  ;;  %v380_v26 = vld [vmem:[%s4513_s3 + $0x28] sm:$0xff]  ;;  %s3576_s21 = smov 127   ;;  %v3000_v58 = vld [vmem:[%s4514_s4 + $0x18] sm:$0xff]  ;;  %vm515_vm2 = vcmask 130048  }
  0x10   : > { %s3221_s9 = smul.u32 72, %s4561_s16  ;;  %s3577_s22 = smov 111   ;;  %vm619_vm3 = vcmask 154624   ;;  %vm739_vm4 = vcmask 138240   ;;  %vm868_vm5 = vcmask 7168   ;;  %vm1113_vm6 = vcmask 1039360  }
  0x11   : > { %s3578_s23 = smov 110   ;;  %s3579_s24 = smov 109   ;;  %vm1242_vm7 = vcmask 908288   ;;  %vm1371_vm8 = vcmask 900096   ;;  %vm1500_vm9 = vcmask 891904   ;;  %vm2925_vm10 = vcmask 1040384  }
  0x12   : > { %s355_s19 = scalar_lea.vmem %s4511_s1, %s3221_s9  ;;  %s3573_s9 = smov 19   ;;  %vm2927_vm11 = vcmask 1041408  }
  0x13   : > { %v370_v1 = vld [vmem:[%s355_s19 + $0x30] sm:$0xff]  ;;  %v371_v2 = vld [vmem:[%s355_s19 + $0x38] sm:$0xff]  ;;  %v372_v3 = vld [vmem:[%s355_s19 + $0x40] sm:$0xff]  ;;  %s3222_s30 = smul.u32 3, %s4561_s16 }
  0x14   : > { %401 = vmatpush.msra.mxu0 %v370_v1  ;;  %424 = vmatpush.msra.mxu1 %v371_v2  ;;  %v367_v4 = vld [vmem:[%s355_s19 + $0x18] sm:$0xff]  ;;  %v368_v5 = vld [vmem:[%s355_s19 + $0x20] sm:$0xff]  ;;  %v369_v6 = vld [vmem:[%s355_s19 + $0x28] sm:$0xff] }
  0x15   : > { %447 = vmatpush.msra.mxu2 %v372_v3  ;;  %v364_v7 = vld [vmem:[%s355_s19] sm:$0xff]  ;;  %v365_v8 = vld [vmem:[%s355_s19 + $0x8] sm:$0xff]  ;;  %v366_v9 = vld [vmem:[%s355_s19 + $0x10] sm:$0xff]  ;;  %s3574_s19 = smov 17  }
  0x16   : > { %402 = vmatpush.msra.mxu0 %v367_v4  ;;  %425 = vmatpush.msra.mxu1 %v368_v5 }
  0x17   : > { %448 = vmatpush.msra.mxu2 %v369_v6 }
  0x18   : > { %403 = vmatpush.msra.mxu0 %v364_v7  ;;  %426 = vmatpush.msra.mxu1 %v365_v8 }
  0x19   : > { %449 = vmatpush.msra.mxu2 %v366_v9  ;;  %2994 = vmatmul.msk.f32.vlgmr.msra.gmra.mxu0 %vm381_vm0, %v373_v10 }
  0x1a   : > { %2996 = vmatmul.msk.f32.vlgmr.msra.gmra.mxu1 %vm381_vm0, %v373_v10  ;;  %2998 = vmatmul.msk.f32.vlgmr.msra.gmra.mxu2 %vm381_vm0, %v373_v10 }
  0x21   : > { %2995 = vmatmul.msk.f32.gmra.mxu0 %vm381_vm0, %v374_v11 }
  0x22   : > { %2997 = vmatmul.msk.f32.gmra.mxu1 %vm381_vm0, %v374_v11  ;;  %2999 = vmatmul.msk.f32.gmra.mxu2 %vm381_vm0, %v374_v11 }
  0x96   : > { %v405_v12 = vpop.f32.mrf.mxu0 }
  0x97   : > { %v428_v13 = vpop.f32.mrf.mxu1  ;;  %v3690_v27 = vadd.f32 %v405_v12, %v375_v23 }
  0x98   : > { %v3692_v29 = vadd.f32 %v428_v13, %v376_v25  ;;  %v3001_v13 = vld [vmem:[%s4514_s4 + $0x20] sm:$0xff] }
  0x99   : > { %v3246_v33 = vpack.i.bf16 %v3690_v27, %v4521_v21 }
  0x9a   : > { %v3266_v35 = vpack.i.bf16 %v3692_v29, %v3690_v27 }
  0x9d   : > { %v451_v15 = vpop.f32.mrf.mxu2 }
  0x9e   : > { %v408_v17 = vpop.f32.mrf.mxu0  ;;  %v3703_v34 = vadd.f32 %v451_v15, %v377_v31  ;;  %v3781_v15 = vld [vmem:[%s4514_s4] sm:$0xff] }
  0x9f   : > { %v3671_v18 = vadd.f32 %v408_v17, %v378_v14  ;;  %v431_v19 = vpop.f32.mrf.mxu1 }
  0xa0   : > { %v3673_v20 = vadd.f32 %v431_v19, %v379_v16  ;;  %v3256_v36 = vpack.i.bf16 %v3703_v34, %v3692_v29  ;;  %v3356_v40 = vpack.i.bf16 0.0, %v3703_v34 }
  0xa1   : > { %v3241_v22 = vpack.i.bf16 %v3671_v18, %v4521_v21  ;;  %v3331_v39 = vpack.i.bf16 %v3690_v27, %v3671_v18 }
  0xa2   : > { %v3261_v24 = vpack.i.bf16 %v3673_v20, %v3671_v18  ;;  %v3306_v38 = vpack.i.bf16 0.0, %v3673_v20 }
  0xa3   : > { %3242 = vrot.lane.b32.xlu0 %v3241_v22, %s3572_s12 }
  0xa4   : > { %3262 = vrot.lane.b32.xlu2 %v3261_v24, %s3573_s9 }
  0xa5   : > { %v454_v28 = vpop.f32.mrf.mxu2 }
  0xa6   : > { %v3694_v30 = vadd.f32 %v454_v28, %v380_v26 }
  0xa8   : > { %v3251_v32 = vpack.i.bf16 %v3694_v30, %v3673_v20  ;;  %v3286_v37 = vpack.i.bf16 %v3703_v34, %v3694_v30  ;;  %v3351_v41 = vpack.i.bf16 0.0, %v3694_v30  ;;  %v3376_v42 = vpack.i.bf16 %v3690_v27, %v3694_v30 }
  0xaa   : > { %3252 = vrot.lane.b32.xlu1 %v3251_v32, %s3572_s12 }
  0xab   : > { %3247 = vrot.lane.b32.xlu0 %v3246_v33, %s3572_s12 }
  0xac   : > { %3267 = vrot.lane.b32.xlu2 %v3266_v35, %s3573_s9 }
  0xb2   : > { %3257 = vrot.lane.b32.xlu1 %v3256_v36, %s3572_s12 }
  0xb3   : > { %3272 = vrot.lane.b32.xlu0 %v4521_v21, %s3573_s9 }
  0xb4   : > { %3277 = vrot.lane.b32.xlu2 %v3241_v22, %s3574_s19 }
  0xba   : > { %3287 = vrot.lane.b32.xlu1 %v3286_v37, %s3573_s9 }
  0xbb   : > { %3282 = vrot.lane.b32.xlu0 %v3246_v33, %s3574_s19 }
  0xbc   : > { %3297 = vrot.lane.b32.xlu2 %v3256_v36, %s3574_s19 }
  0xc2   : > { %3292 = vrot.lane.b32.xlu1 %v3251_v32, %s3574_s19 }
  0xc3   : > { %3302 = vrot.lane.b32.xlu0 %v3241_v22, %s3575_s20 }
  0xc4   : > { %3312 = vrot.lane.b32.xlu2 %v3266_v35, %s3575_s20 }
  0xca   : > { %3307 = vrot.lane.b32.xlu1 %v3306_v38, %s3575_s20 }
  0xcb   : > { %3317 = vrot.lane.b32.xlu0 %v3286_v37, %s3575_s20 }
  0xcc   : > { %3327 = vrot.lane.b32.xlu2 %v3256_v36, %s3576_s21 }
  0xd2   : > { %3322 = vrot.lane.b32.xlu1 %v3251_v32, %s3576_s21  ;;  %v3002_v32 = vld [vmem:[%s4514_s4 + $0x28] sm:$0xff] }
  0xd3   : > { %3332 = vrot.lane.b32.xlu0 %v3331_v39, %s3576_s21 }
  0xd4   : > { %3342 = vrot.lane.b32.xlu2 %v3261_v24, %s3577_s22 }
  0xda   : > { %3337 = vrot.lane.b32.xlu1 %v4521_v21, %s3576_s21 }
  0xdb   : > { %3347 = vrot.lane.b32.xlu0 %v3266_v35, %s3577_s22 }
  0xdc   : > { %3357 = vrot.lane.b32.xlu2 %v3356_v40, %s3577_s22 }
  0xe2   : > { %3352 = vrot.lane.b32.xlu1 %v3351_v41, %s3577_s22 }
  0xe3   : > { %3362 = vrot.lane.b32.xlu0 %v3261_v24, %s3578_s23 }
  0xe4   : > { %3367 = vrot.lane.b32.xlu2 %v3256_v36, %s3578_s23 }
  0xea   : > { %3377 = vrot.lane.b32.xlu1 %v3376_v42, %s3578_s23 }
  0xeb   : > { %3372 = vrot.lane.b32.xlu0 %v3261_v24, %s3579_s24 }
  0xec   : > { %3387 = vrot.lane.b32.xlu2 %v4521_v21, %s3578_s23 }
  0xf2   : > { %3382 = vrot.lane.b32.xlu1 %v3266_v35, %s3579_s24  ;;  %v3798_v35 = vld [vmem:[%s4514_s4 + $0x8] sm:$0xff] }
  0xf3   : > { %3392 = vrot.lane.b32.xlu0 %v3351_v41, %s3579_s24 }
  0xfa   : > { %3397 = vrot.lane.b32.xlu1 %v3356_v40, %s3579_s24 }
  0xfe   : > { %v3751_v43 = vpop.permute.xlu2 %3262 }
  0xff   : > { %v3265_v53 = vunpack.i.h.bf16 %v3751_v43  ;;  %v3264_v54 = vunpack.i.l.bf16 %v3751_v43 }
 0x101   : > { %v624_v0 = vsel %vm619_vm3, %v3264_v54, %v3265_v53 }
 0x106   : > { %v3753_v47 = vpop.permute.xlu2 %3267 }
 0x107   : > { %v3270_v60 = vunpack.i.h.bf16 %v3753_v47  ;;  %v3269_v61 = vunpack.i.l.bf16 %v3753_v47 }
 0x109   : > { %v621_v2 = vsel %vm619_vm3, %v3269_v61, %v3270_v60 }
 0x10e   : > { %v3278_v63 = vpop.permute.xlu2 %3277 }
 0x10f   : > { %v3280_v3 = vunpack.i.h.bf16 %v3278_v63  ;;  %v3279_v4 = vunpack.i.l.bf16 %v3278_v63 }
 0x111   : > { %v743_v14 = vsel %vm739_vm4, %v3279_v4, %v3280_v3 }
 0x115   : > { %v3243_v44 = vpop.permute.xlu0 %3242 }
 0x116   : > { %v3245_v45 = vunpack.i.h.bf16 %v3243_v44  ;;  %v3244_v46 = vunpack.i.l.bf16 %v3243_v44  ;;  %v3298_v28 = vpop.permute.xlu2 %3297 }
 0x117   : > { %v3300_v37 = vunpack.i.h.bf16 %v3298_v28  ;;  %v3299_v38 = vunpack.i.l.bf16 %v3298_v28 }
 0x118   : > { %v506_v48 = vsel %vm502_vm1, %v3244_v46, %v3245_v45 }
 0x119   : > { %539 = vmatpush.msra.mxu3 %v506_v48  ;;  %v742_v48 = vsel %vm739_vm4, %v3299_v38, %v3300_v37 }
 0x11c   : > { %v3253_v49 = vpop.permute.xlu1 %3252 }
 0x11d   : > { %v3255_v50 = vunpack.i.h.bf16 %v3253_v49  ;;  %v3254_v51 = vunpack.i.l.bf16 %v3253_v49  ;;  %v3248_v52 = vpop.permute.xlu0 %3247 }
 0x11e   : > { %v3250_v55 = vunpack.i.h.bf16 %v3248_v52  ;;  %v3249_v56 = vunpack.i.l.bf16 %v3248_v52  ;;  %v3313_v49 = vpop.permute.xlu2 %3312 }
 0x11f   : > { %v507_v57 = vsel %vm502_vm1, %v3245_v45, %v3254_v51  ;;  %v508_v59 = vsel %vm502_vm1, %v3254_v51, %v3255_v50  ;;  %v473_v50 = vld [vmem:[%s4514_s4 + $0x10] sm:$0xff]  ;;  %v3315_v52 = vunpack.i.h.bf16 %v3313_v49 }
 0x120   : > { %565 = vmatpush.msrb.mxu0 %v507_v57  ;;  %v503_v62 = vsel %vm502_vm1, %v3249_v56, %v3250_v55  ;;  %591 = vmatpush.msrb.mxu1 %v508_v59 }
 0x121   : > { %540 = vmatpush.msra.mxu3 %v503_v62 }
 0x122   : > { %3003 = vmatmul.msk.f32.vlgmr.msra.gmra.mxu3 %vm515_vm2, %v3000_v58 }
 0x123   : > { %681 = vmatpush.msrb.mxu3 %v624_v0 }
 0x124   : > { %v3258_v1 = vpop.permute.xlu1 %3257 }
 0x125   : > { %v3260_v5 = vunpack.i.h.bf16 %v3258_v1  ;;  %v3259_v6 = vunpack.i.l.bf16 %v3258_v1  ;;  %682 = vmatpush.msrb.mxu3 %v621_v2  ;;  %v3273_v7 = vpop.permute.xlu0 %3272 }
 0x126   : > { %v3274_v8 = vunpack.i.l.bf16 %v3273_v7  ;;  %v3275_v9 = vunpack.i.h.bf16 %v3273_v7  ;;  %v3328_v1 = vpop.permute.xlu2 %3327 }
 0x127   : > { %v504_v10 = vsel %vm502_vm1, %v3250_v55, %v3259_v6  ;;  %v505_v11 = vsel %vm502_vm1, %v3259_v6, %v3260_v5  ;;  %v3023_v6 = vld [vmem:[%s4514_s4 + $0x40] sm:$0xff] }
 0x128   : > { %566 = vmatpush.msrb.mxu0 %v504_v10  ;;  %592 = vmatpush.msrb.mxu1 %v505_v11  ;;  %v623_v12 = vsel %vm619_vm3, %v3274_v8, %v3264_v54  ;;  %v620_v16 = vsel %vm619_vm3, %v3275_v9, %v3269_v61  ;;  %v3330_v8 = vunpack.i.h.bf16 %v3328_v1 }
 0x129   : > { %3006 = vmatmul.msk.f32.vlgmr.msrb.gmra.mxu0 %vm515_vm2, %v3000_v58  ;;  %3009 = vmatmul.msk.f32.vlgmr.msrb.gmra.mxu1 %vm515_vm2, %v3000_v58  ;;  %v3021_v58 = vld [vmem:[%s4514_s4 + $0x30] sm:$0xff] }
 0x12a   : > { %775 = vmatpush.msra.mxu1 %v743_v14  ;;  %655 = vmatpush.msrb.mxu2 %v623_v12 }
 0x12b   : > { %3004 = vmatmul.msk.f32.gmra.mxu3 %vm515_vm2, %v3001_v13 }
 0x12c   : > { %v3288_v17 = vpop.permute.xlu1 %3287  ;;  %656 = vmatpush.msrb.mxu2 %v620_v16  ;;  %v3033_v16 = vld [vmem:[%s4514_s4 + $0x48] sm:$0xff] }
 0x12d   : > { %v3290_v19 = vunpack.i.h.bf16 %v3288_v17  ;;  %v3289_v22 = vunpack.i.l.bf16 %v3288_v17  ;;  %3012 = vmatmul.msk.f32.vlgmr.msrb.gmra.mxu2 %vm515_vm2, %v3781_v15  ;;  %v3283_v23 = vpop.permute.xlu0 %3282 }
 0x12e   : > { %v3285_v24 = vunpack.i.h.bf16 %v3283_v23  ;;  %v3284_v25 = vunpack.i.l.bf16 %v3283_v23  ;;  %v3343_v9 = vpop.permute.xlu2 %3342 }
 0x12f   : > { %v625_v26 = vsel %vm619_vm3, %v3265_v53, %v3289_v22  ;;  %v622_v33 = vsel %vm619_vm3, %v3270_v60, %v3290_v19  ;;  %v3314_v53 = vunpack.i.l.bf16 %v3313_v49  ;;  %v3345_v12 = vunpack.i.h.bf16 %v3343_v9 }
 0x130   : > { %707 = vmatpush.msra.mxu0 %v625_v26  ;;  %v740_v31 = vsel %vm739_vm4, %v3284_v25, %v3285_v24  ;;  %v741_v47 = vsel %vm739_vm4, %v3285_v24, %v3299_v38  ;;  %v3035_v38 = vld [vmem:[%s4514_s4 + $0x58] sm:$0xff] }
 0x131   : > { %3007 = vmatmul.msk.f32.gmra.mxu0 %vm515_vm2, %v3001_v13  ;;  %3010 = vmatmul.msk.f32.gmra.mxu1 %vm515_vm2, %v3001_v13  ;;  %v3344_v13 = vunpack.i.l.bf16 %v3343_v9 }
 0x132   : > { %708 = vmatpush.msra.mxu0 %v622_v33  ;;  %776 = vmatpush.msra.mxu1 %v740_v31 }
 0x133   : > { %3005 = vmatmul.msk.f32.gmra.mxu3 %vm515_vm2, %v3002_v32  ;;  %v1246_v25 = vsel %vm1242_vm7, %v3344_v13, %v3345_v12 }
 0x134   : > { %v3293_v36 = vpop.permute.xlu1 %3292 }
 0x135   : > { %v3295_v39 = vunpack.i.h.bf16 %v3293_v36  ;;  %v3294_v40 = vunpack.i.l.bf16 %v3293_v36  ;;  %3013 = vmatmul.msk.f32.gmra.mxu2 %vm515_vm2, %v3798_v35  ;;  %v3303_v41 = vpop.permute.xlu0 %3302  ;;  %v3034_v36 = vld [vmem:[%s4514_s4 + $0x50] sm:$0xff] }
 0x136   : > { %v3305_v42 = vunpack.i.h.bf16 %v3303_v41  ;;  %v3304_v43 = vunpack.i.l.bf16 %v3303_v41  ;;  %v3358_v28 = vpop.permute.xlu2 %3357  ;;  %v3045_v41 = vld [vmem:[%s4514_s4 + $0x60] sm:$0xff] }
 0x137   : > { %v744_v44 = vsel %vm739_vm4, %v3280_v3, %v3294_v40  ;;  %v745_v45 = vsel %vm739_vm4, %v3294_v40, %v3295_v39  ;;  %v3022_v3 = vld [vmem:[%s4514_s4 + $0x38] sm:$0xff]  ;;  %v3359_v33 = vunpack.i.l.bf16 %v3358_v28 }
 0x138   : > { %801 = vmatpush.msra.mxu2 %v744_v44  ;;  %827 = vmatpush.msra.mxu3 %v745_v45  ;;  %v872_v46 = vsel %vm868_vm5, %v3304_v43, %v3305_v42 }
 0x139   : > { %3008 = vmatmul.msk.f32.gmra.mxu0 %vm515_vm2, %v3002_v32  ;;  %3011 = vmatmul.msk.f32.gmra.mxu1 %vm515_vm2, %v3002_v32 }
 0x13a   : > { %802 = vmatpush.msra.mxu2 %v741_v47  ;;  %828 = vmatpush.msra.mxu3 %v742_v48 }
 0x13b   : > { %904 = vmatpush.msrb.mxu0 %v872_v46  ;;  %3015 = vmatmul.msk.f32.vlgmr.msrb.gmra.mxu3 %vm515_vm2, %v3781_v15 }
 0x13c   : > { %1004 = vmatpush.msrb.mxu3 %v3671_v18  ;;  %v3308_v51 = vpop.permute.xlu1 %3307 }
 0x13d   : > { %v3310_v54 = vunpack.i.h.bf16 %v3308_v51  ;;  %v3309_v55 = vunpack.i.l.bf16 %v3308_v51  ;;  %3014 = vmatmul.msk.f32.gmra.mxu2 %vm515_vm2, %v473_v50  ;;  %v3318_v56 = vpop.permute.xlu0 %3317 }
 0x13e   : > { %1005 = vmatpush.msrb.mxu3 %v3690_v27  ;;  %v3319_v57 = vunpack.i.l.bf16 %v3318_v56  ;;  %v3320_v18 = vunpack.i.h.bf16 %v3318_v56  ;;  %v870_v27 = vsel %vm868_vm5, %v3314_v53, %v3315_v52  ;;  %v3368_v39 = vpop.permute.xlu2 %3367 }
 0x13f   : > { %v869_v59 = vsel %vm868_vm5, %v3310_v54, %v3314_v53  ;;  %v873_v60 = vsel %vm868_vm5, %v3305_v42, %v3309_v55  ;;  %v3360_v42 = vunpack.i.h.bf16 %v3358_v28  ;;  %v3370_v51 = vunpack.i.h.bf16 %v3368_v39  ;;  %v3046_v53 = vld [vmem:[%s4514_s4 + $0x68] sm:$0xff] }
 0x140   : > { %905 = vmatpush.msrb.mxu0 %v869_v59  ;;  %930 = vmatpush.msrb.mxu1 %v873_v60  ;;  %v874_v61 = vsel %vm868_vm5, %v3309_v55, %v3319_v57  ;;  %v871_v63 = vsel %vm868_vm5, %v3315_v52, %v3320_v18  ;;  %v3369_v52 = vunpack.i.l.bf16 %v3368_v39  ;;  %v3057_v59 = vld [vmem:[%s4514_s4 + $0x78] sm:$0xff] }
 0x141   : > { %3018 = vmatmul.msk.f32.vlgmr.msra.gmra.mxu0 %vm515_vm2, %v3781_v15  ;;  %3024 = vmatmul.msk.f32.vlgmr.msra.gmra.mxu1 %vm515_vm2, %v3021_v58  ;;  %v1245_v48 = vsel %vm1242_vm7, %v3359_v33, %v3360_v42 }
 0x142   : > { %1030 = vmatpush.msra.mxu0 %v3673_v20  ;;  %931 = vmatpush.msrb.mxu1 %v870_v27  ;;  %v1373_v18 = vsel %vm1371_vm8, %v3369_v52, %v3370_v51 }
 0x143   : > { %956 = vmatpush.msrb.mxu2 %v874_v61  ;;  %3016 = vmatmul.msk.f32.gmra.mxu3 %vm515_vm2, %v3798_v35 }
 0x144   : > { %1031 = vmatpush.msra.mxu0 %v3692_v29  ;;  %1056 = vmatpush.msra.mxu1 %v3694_v30  ;;  %v3323_v62 = vpop.permute.xlu1 %3322  ;;  %v3329_v30 = vunpack.i.l.bf16 %v3328_v1  ;;  %v3058_v1 = vld [vmem:[%s4514_s4 + $0x80] sm:$0xff] }
 0x145   : > { %957 = vmatpush.msrb.mxu2 %v871_v63  ;;  %v3333_v0 = vpop.permute.xlu0 %3332  ;;  %v3324_v2 = vunpack.i.l.bf16 %v3323_v62  ;;  %v3325_v7 = vunpack.i.h.bf16 %v3323_v62  ;;  %v3047_v63 = vld [vmem:[%s4514_s4 + $0x70] sm:$0xff] }
 0x146   : > { %3027 = vmatmul.msk.f32.vlgmr.msra.gmra.mxu2 %vm515_vm2, %v3021_v58  ;;  %1057 = vmatpush.msra.mxu1 %v3703_v34  ;;  %v3334_v20 = vunpack.i.l.bf16 %v3333_v0  ;;  %v3335_v4 = vunpack.i.h.bf16 %v3333_v0  ;;  %v1115_v15 = vsel %vm1113_vm6, %v3329_v30, %v3330_v8  ;;  %v3388_v54 = vpop.permute.xlu2 %3387 }
 0x147   : > { %v1118_v10 = vsel %vm1113_vm6, %v3324_v2, %v3325_v7  ;;  %v3389_v56 = vunpack.i.l.bf16 %v3388_v54  ;;  %v3390_v60 = vunpack.i.h.bf16 %v3388_v54 }
 0x148   : > { %v1117_v29 = vsel %vm1113_vm6, %v3334_v20, %v3324_v2  ;;  %v1114_v34 = vsel %vm1113_vm6, %v3335_v4, %v3329_v30 }
 0x149   : > { %3019 = vmatmul.msk.f32.gmra.mxu0 %vm515_vm2, %v3798_v35  ;;  %3025 = vmatmul.msk.f32.gmra.mxu1 %vm515_vm2, %v3022_v3  ;;  %v1374_v62 = vsel %vm1371_vm8, %v3370_v51, %v3390_v60 }
 0x14a   : > { %1149 = vmatpush.msra.mxu2 %v1117_v29 }
 0x14b   : > { %3017 = vmatmul.msk.f32.gmra.mxu3 %vm515_vm2, %v473_v50 }
 0x14c   : > { %1150 = vmatpush.msra.mxu2 %v1114_v34  ;;  %v3338_v5 = vpop.permute.xlu1 %3337  ;;  %v3059_v34 = vld [vmem:[%s4514_s4 + $0x88] sm:$0xff] }
 0x14d   : > { %v3348_v11 = vpop.permute.xlu0 %3347  ;;  %v3339_v14 = vunpack.i.l.bf16 %v3338_v5  ;;  %v3340_v17 = vunpack.i.h.bf16 %v3338_v5 }
 0x14e   : > { %3028 = vmatmul.msk.f32.gmra.mxu2 %vm515_vm2, %v3022_v3  ;;  %v3350_v19 = vunpack.i.h.bf16 %v3348_v11  ;;  %v3349_v22 = vunpack.i.l.bf16 %v3348_v11 }
 0x14f   : > { %v1119_v24 = vsel %vm1113_vm6, %v3325_v7, %v3339_v14  ;;  %v1116_v31 = vsel %vm1113_vm6, %v3330_v8, %v3340_v17  ;;  %v3071_v17 = vld [vmem:[%s4514_s4 + $0xa0] sm:$0xff] }
 0x150   : > { %v1243_v32 = vsel %vm1242_vm7, %v3349_v22, %v3350_v19  ;;  %v1244_v37 = vsel %vm1242_vm7, %v3350_v19, %v3359_v33  ;;  %v3081_v19 = vld [vmem:[%s4514_s4 + $0xa8] sm:$0xff] }
 0x151   : > { %3020 = vmatmul.msk.f32.gmra.mxu0 %vm515_vm2, %v473_v50  ;;  %3026 = vmatmul.msk.f32.gmra.mxu1 %vm515_vm2, %v3023_v6 }
 0x153   : > { %3030 = vmatmul.msk.f32.vlgmr.msra.gmra.mxu3 %vm515_vm2, %v3021_v58 }
 0x154   : > { %1175 = vmatpush.msra.mxu3 %v1118_v10  ;;  %v3353_v23 = vpop.permute.xlu1 %3352  ;;  %v3069_v10 = vld [vmem:[%s4514_s4 + $0x90] sm:$0xff] }
 0x155   : > { %v3354_v26 = vunpack.i.l.bf16 %v3353_v23  ;;  %v3355_v40 = vunpack.i.h.bf16 %v3353_v23  ;;  %v3363_v43 = vpop.permute.xlu0 %3362 }
 0x156   : > { %3029 = vmatmul.msk.f32.gmra.mxu2 %vm515_vm2, %v3023_v6  ;;  %1176 = vmatpush.msra.mxu3 %v1115_v15  ;;  %v3365_v46 = vunpack.i.h.bf16 %v3363_v43  ;;  %v3364_v47 = vunpack.i.l.bf16 %v3363_v43 }
 0x157   : > { %v1247_v35 = vsel %vm1242_vm7, %v3345_v12, %v3354_v26  ;;  %v1248_v45 = vsel %vm1242_vm7, %v3354_v26, %v3355_v40  ;;  %v3094_v40 = vld [vmem:[%s4514_s4 + $0xc8] sm:$0xff] }
 0x158   : > { %v1375_v55 = vsel %vm1371_vm8, %v3364_v47, %v3365_v46 }
 0x159   : > { %3036 = vmatmul.msk.f32.vlgmr.msrb.gmra.mxu0 %vm515_vm2, %v3033_v16  ;;  %3039 = vmatmul.msk.f32.vlgmr.msrb.gmra.mxu1 %vm515_vm2, %v3033_v16 }
 0x15a   : > { %1201 = vmatpush.msrb.mxu0 %v1119_v24  ;;  %1278 = vmatpush.msrb.mxu1 %v1246_v25  ;;  %v3082_v25 = vld [vmem:[%s4514_s4 + $0xb0] sm:$0xff] }
 0x15b   : > { %3031 = vmatmul.msk.f32.gmra.mxu3 %vm515_vm2, %v3022_v3 }
 0x15c   : > { %1202 = vmatpush.msrb.mxu0 %v1116_v31  ;;  %1279 = vmatpush.msrb.mxu1 %v1243_v32  ;;  %v3378_v44 = vpop.permute.xlu1 %3377  ;;  %v3083_v31 = vld [vmem:[%s4514_s4 + $0xb8] sm:$0xff] }
 0x15d   : > { %v3379_v49 = vunpack.i.l.bf16 %v3378_v44  ;;  %v3380_v50 = vunpack.i.h.bf16 %v3378_v44  ;;  %v3373_v27 = vpop.permute.xlu0 %3372 }
 0x15e   : > { %3042 = vmatmul.msk.f32.vlgmr.msrb.gmra.mxu2 %vm515_vm2, %v3033_v16  ;;  %v3375_v2 = vunpack.i.h.bf16 %v3373_v27  ;;  %v3374_v20 = vunpack.i.l.bf16 %v3373_v27  ;;  %v3070_v16 = vld [vmem:[%s4514_s4 + $0x98] sm:$0xff] }
 0x15f   : > { %1304 = vmatpush.msrb.mxu2 %v1247_v35  ;;  %v1376_v57 = vsel %vm1371_vm8, %v3365_v46, %v3379_v49  ;;  %v1372_v58 = vsel %vm1371_vm8, %v3380_v50, %v3369_v52  ;;  %v1377_v61 = vsel %vm1371_vm8, %v3379_v49, %v3389_v56  ;;  %v3093_v35 = vld [vmem:[%s4514_s4 + $0xc0] sm:$0xff] }
 0x160   : > { %v1504_v30 = vsel %vm1500_vm9, %v3374_v20, %v3375_v2 }
 0x161   : > { %1305 = vmatpush.msrb.mxu2 %v1244_v37  ;;  %3037 = vmatmul.msk.f32.gmra.mxu0 %vm515_vm2, %v3034_v36 }
 0x162   : > { %3040 = vmatmul.msk.f32.gmra.mxu1 %vm515_vm2, %v3034_v36 }
 0x163   : > { %3032 = vmatmul.msk.f32.gmra.mxu3 %vm515_vm2, %v3023_v6 }
 0x164   : > { %v3383_v0 = vpop.permute.xlu1 %3382 }
 0x165   : > { %v3385_v3 = vunpack.i.h.bf16 %v3383_v0  ;;  %v3384_v4 = vunpack.i.l.bf16 %v3383_v0  ;;  %v3393_v29 = vpop.permute.xlu0 %3392 }
 0x166   : > { %3043 = vmatmul.msk.f32.gmra.mxu2 %vm515_vm2, %v3034_v36  ;;  %v3394_v6 = vunpack.i.l.bf16 %v3393_v29  ;;  %v3395_v8 = vunpack.i.h.bf16 %v3393_v29 }
 0x167   : > { %v1501_v7 = vsel %vm1500_vm9, %v3384_v4, %v3385_v3 }
 0x168   : > { %v1505_v12 = vsel %vm1500_vm9, %v3375_v2, %v3394_v6  ;;  %v1506_v13 = vsel %vm1500_vm9, %v3394_v6, %v3395_v8 }
 0x169   : > { %3038 = vmatmul.msk.f32.gmra.mxu0 %vm515_vm2, %v3035_v38 }
 0x16a   : > { %3041 = vmatmul.msk.f32.gmra.mxu1 %vm515_vm2, %v3035_v38 }
 0x16b   : > { %3048 = vmatmul.msk.f32.vlgmr.msrb.gmra.mxu3 %vm515_vm2, %v3045_v41 }
 0x16c   : > { %1330 = vmatpush.msrb.mxu3 %v1248_v45  ;;  %v3398_v5 = vpop.permute.xlu1 %3397  ;;  %v3095_v45 = vld [vmem:[%s4514_s4 + $0xd0] sm:$0xff] }
 0x16d   : > { %v3399_v9 = vunpack.i.l.bf16 %v3398_v5  ;;  %v3400_v11 = vunpack.i.h.bf16 %v3398_v5 }
 0x16e   : > { %3044 = vmatmul.msk.f32.gmra.mxu2 %vm515_vm2, %v3035_v38  ;;  %1331 = vmatpush.msrb.mxu3 %v1245_v48 }
 0x16f   : > { %v1502_v14 = vsel %vm1500_vm9, %v3385_v3, %v3399_v9  ;;  %v1503_v15 = vsel %vm1500_vm9, %v3399_v9, %v3400_v11 }
 0x171   : > { %3051 = vmatmul.msk.f32.vlgmr.msra.gmra.mxu0 %vm515_vm2, %v3045_v41 }
 0x172   : > { %3054 = vmatmul.msk.f32.vlgmr.msra.gmra.mxu1 %vm515_vm2, %v3045_v41  ;;  %1407 = vmatpush.msra.mxu0 %v1375_v55 }
 0x173   : > { %1433 = vmatpush.msra.mxu1 %v1376_v57  ;;  %3049 = vmatmul.msk.f32.gmra.mxu3 %vm515_vm2, %v3046_v53 }
 0x174   : > { %1408 = vmatpush.msra.mxu0 %v1372_v58 }
 0x175   : > { %1434 = vmatpush.msra.mxu1 %v1373_v18 }
 0x176   : > { %3060 = vmatmul.msk.f32.vlgmr.msra.gmra.mxu2 %vm515_vm2, %v3057_v59 }
 0x177   : > { %1459 = vmatpush.msra.mxu2 %v1377_v61 }
 0x179   : > { %1460 = vmatpush.msra.mxu2 %v1374_v62  ;;  %3052 = vmatmul.msk.f32.gmra.mxu0 %vm515_vm2, %v3046_v53 }
 0x17a   : > { %3055 = vmatmul.msk.f32.gmra.mxu1 %vm515_vm2, %v3046_v53 }
 0x17b   : > { %3050 = vmatmul.msk.f32.gmra.mxu3 %vm515_vm2, %v3047_v63 }
 0x17e   : > { %3061 = vmatmul.msk.f32.gmra.mxu2 %vm515_vm2, %v3058_v1 }
 0x181   : > { %3053 = vmatmul.msk.f32.gmra.mxu0 %vm515_vm2, %v3047_v63 }
 0x182   : > { %3056 = vmatmul.msk.f32.gmra.mxu1 %vm515_vm2, %v3047_v63 }
 0x183   : > { %3063 = vmatmul.msk.f32.vlgmr.msra.gmra.mxu3 %vm515_vm2, %v3057_v59 }
 0x184   : > { %1536 = vmatpush.msra.mxu3 %v1504_v30 }
 0x186   : > { %3062 = vmatmul.msk.f32.gmra.mxu2 %vm515_vm2, %v3059_v34  ;;  %1537 = vmatpush.msra.mxu3 %v1501_v7 }
 0x189   : > { %3066 = vmatmul.msk.f32.vlgmr.msrb.gmra.mxu0 %vm515_vm2, %v3057_v59 }
 0x18a   : > { %3072 = vmatmul.msk.f32.vlgmr.msrb.gmra.mxu1 %vm515_vm2, %v3069_v10  ;;  %1562 = vmatpush.msrb.mxu0 %v1505_v12 }
 0x18b   : > { %1588 = vmatpush.msrb.mxu1 %v1506_v13  ;;  %3064 = vmatmul.msk.f32.gmra.mxu3 %vm515_vm2, %v3058_v1 }
 0x18c   : > { %1563 = vmatpush.msrb.mxu0 %v1502_v14 }
 0x18d   : > { %1589 = vmatpush.msrb.mxu1 %v1503_v15 }
 0x18e   : > { %3075 = vmatmul.msk.f32.vlgmr.msrb.gmra.mxu2 %vm515_vm2, %v3069_v10 }
 0x191   : > { %3067 = vmatmul.msk.f32.gmra.mxu0 %vm515_vm2, %v3058_v1 }
 0x192   : > { %3073 = vmatmul.msk.f32.gmra.mxu1 %vm515_vm2, %v3070_v16 }
 0x193   : > { %3065 = vmatmul.msk.f32.gmra.mxu3 %vm515_vm2, %v3059_v34 }
 0x196   : > { %3076 = vmatmul.msk.f32.gmra.mxu2 %vm515_vm2, %v3070_v16 }
 0x199   : > { %3068 = vmatmul.msk.f32.gmra.mxu0 %vm515_vm2, %v3059_v34 }
 0x19a   : > { %3074 = vmatmul.msk.f32.gmra.mxu1 %vm515_vm2, %v3071_v17 }
 0x19b   : > { %3078 = vmatmul.msk.f32.vlgmr.msrb.gmra.mxu3 %vm515_vm2, %v3069_v10 }
 0x19e   : > { %3077 = vmatmul.msk.f32.gmra.mxu2 %vm515_vm2, %v3071_v17 }
 0x1a1   : > { %3084 = vmatmul.msk.f32.vlgmr.msra.gmra.mxu0 %vm515_vm2, %v3081_v19 }
 0x1a2   : > { %3087 = vmatmul.msk.f32.vlgmr.msra.gmra.mxu1 %vm515_vm2, %v3081_v19 }
 0x1a3   : > { %3079 = vmatmul.msk.f32.gmra.mxu3 %vm515_vm2, %v3070_v16 }
 0x1a5   : > { %v3953_v22 = vpop.f32.mrf.mxu3 }
 0x1a6   : > { %3090 = vmatmul.msk.f32.vlgmr.msra.gmra.mxu2 %vm515_vm2, %v3081_v19  ;;  %v3956_v23 = vpop.f32.mrf.mxu0  ;;  %v3958_v24 = vpop.f32.mrf.mxu1 }
 0x1a9   : > { %3085 = vmatmul.msk.f32.gmra.mxu0 %vm515_vm2, %v3082_v25 }
 0x1aa   : > { %3088 = vmatmul.msk.f32.gmra.mxu1 %vm515_vm2, %v3082_v25 }
 0x1ab   : > { %3080 = vmatmul.msk.f32.gmra.mxu3 %vm515_vm2, %v3071_v17 }
 0x1ae   : > { %3091 = vmatmul.msk.f32.gmra.mxu2 %vm515_vm2, %v3082_v25  ;;  %v3967_v26 = vpop.f32.mrf.mxu3  ;;  %v3969_v28 = vpop.f32.mrf.mxu0 }
 0x1af   : > { %v3974_v32 = vpop.f32.mrf.mxu1 }
 0x1b0   : > { %v3976_v33 = vpop.f32.mrf.mxu2 }
 0x1b1   : > { %3086 = vmatmul.msk.f32.gmra.mxu0 %vm515_vm2, %v3083_v31 }
 0x1b2   : > { %3089 = vmatmul.msk.f32.gmra.mxu1 %vm515_vm2, %v3083_v31 }
 0x1b3   : > { %3096 = vmatmul.msk.f32.vlgmr.msra.gmra.mxu3 %vm515_vm2, %v3093_v35 }
 0x1b6   : > { %3092 = vmatmul.msk.f32.gmra.mxu2 %vm515_vm2, %v3083_v31  ;;  %v3985_v36 = vpop.f32.mrf.mxu3  ;;  %v3987_v37 = vpop.f32.mrf.mxu0 }
 0x1b7   : > { %v3989_v38 = vpop.f32.mrf.mxu1 }
 0x1b8   : > { %v3991_v39 = vpop.f32.mrf.mxu2 }
 0x1b9   : > { %3099 = vmatmul.msk.f32.vlgmr.msrb.gmra.mxu0 %vm515_vm2, %v3093_v35 }
 0x1ba   : > { %3102 = vmatmul.msk.f32.vlgmr.msrb.gmra.mxu1 %vm515_vm2, %v3093_v35 }
 0x1bb   : > { %3097 = vmatmul.msk.f32.gmra.mxu3 %vm515_vm2, %v3094_v40 }
 0x1be   : > { %v3999_v41 = vpop.f32.mrf.mxu3  ;;  %v4001_v42 = vpop.f32.mrf.mxu0 }
 0x1bf   : > { %v4003_v43 = vpop.f32.mrf.mxu1 }
 0x1c0   : > { %v4005_v44 = vpop.f32.mrf.mxu2 }
 0x1c1   : > { %3100 = vmatmul.msk.f32.gmra.mxu0 %vm515_vm2, %v3094_v40 }
 0x1c2   : > { %3103 = vmatmul.msk.f32.gmra.mxu1 %vm515_vm2, %v3094_v40 }
 0x1c3   : > { %3098 = vmatmul.msk.f32.gmra.mxu3 %vm515_vm2, %v3095_v45 }
 0x1c6   : > { %v4013_v46 = vpop.f32.mrf.mxu3  ;;  %v4015_v47 = vpop.f32.mrf.mxu0 }
 0x1c7   : > { %v4017_v48 = vpop.f32.mrf.mxu1 }
 0x1c9   : > { %v4019_v49 = vpop.f32.mrf.mxu2  ;;  %3101 = vmatmul.msk.f32.gmra.mxu0 %vm515_vm2, %v3095_v45 }
 0x1ca   : > { %3104 = vmatmul.msk.f32.gmra.mxu1 %vm515_vm2, %v3095_v45 }
 0x1ce   : > { %v690_v50 = vpop.f32.mrf.mxu3  ;;  %v4023_v51 = vpop.f32.mrf.mxu0 }
 0x1cf   : > { %v784_v52 = vpop.f32.mrf.mxu1 }
 0x1d1   : > { %v807_v53 = vpop.f32.mrf.mxu2 }
 0x1d6   : > { %v4025_v54 = vpop.f32.mrf.mxu3  ;;  %v4027_v55 = vpop.f32.mrf.mxu0 }
 0x1d7   : > { %v4029_v56 = vpop.f32.mrf.mxu1 }
 0x1d9   : > { %v810_v57 = vpop.f32.mrf.mxu2 }
 0x1de   : > { %v4031_v58 = vpop.f32.mrf.mxu3  ;;  %v4033_v59 = vpop.f32.mrf.mxu0 }
 0x1df   : > { %v4035_v60 = vpop.f32.mrf.mxu1 }
 0x1e1   : > { %v4037_v18 = vpop.f32.mrf.mxu2 }
 0x1e6   : > { %v4039_v61 = vpop.f32.mrf.mxu3  ;;  %v913_v27 = vpop.f32.mrf.mxu0 }
 0x1e7   : > { %v939_v62 = vpop.f32.mrf.mxu1 }
 0x1e9   : > { %v4041_v63 = vpop.f32.mrf.mxu2 }
 0x1ee   : > { %v4043_v0 = vpop.f32.mrf.mxu3  ;;  %v4045_v1 = vpop.f32.mrf.mxu0 }
 0x1ef   : > { %v4047_v2 = vpop.f32.mrf.mxu1 }
 0x1f0   : > { %4523 = vst [vmem:[#allocation4_spill] sm:$0xff] %v4047_v2 }
 0x1f1   : > { %v4049_v20 = vpop.f32.mrf.mxu2 }
 0x1f6   : > { %v4051_v3 = vpop.f32.mrf.mxu3  ;;  %v4053_v4 = vpop.f32.mrf.mxu0 }
 0x1f7   : > { %v4055_v29 = vpop.f32.mrf.mxu1 }
 0x1f8   : > { %4524 = vst [vmem:[#allocation5_spill] sm:$0xff] %v4055_v29 }
 0x1f9   : > { %v4057_v30 = vpop.f32.mrf.mxu2 }
 0x1fe   : > { %v1013_v34 = vpop.f32.mrf.mxu3  ;;  %v1039_v5 = vpop.f32.mrf.mxu0 }
 0x1ff   : > { %v4059_v6 = vpop.f32.mrf.mxu1 }
 0x201   : > { %v4061_v7 = vpop.f32.mrf.mxu2 }
 0x206   : > { %v4063_v8 = vpop.f32.mrf.mxu3  ;;  %v4065_v9 = vpop.f32.mrf.mxu0 }
 0x207   : > { %4525 = vst [vmem:[#allocation6_spill] sm:$0xff] %v4065_v9  ;;  %v4067_v10 = vpop.f32.mrf.mxu1 }
 0x208   : > { %4526 = vst [vmem:[#allocation7_spill] sm:$0xff] %v4067_v10 }
 0x209   : > { %v1158_v11 = vpop.f32.mrf.mxu2 }
 0x20e   : > { %v1181_v12 = vpop.f32.mrf.mxu3  ;;  %v4069_v13 = vpop.f32.mrf.mxu0 }
 0x20f   : > { %4527 = vst [vmem:[#allocation8_spill] sm:$0xff] %v4069_v13  ;;  %v4071_v14 = vpop.f32.mrf.mxu1 }
 0x211   : > { %v4073_v15 = vpop.f32.mrf.mxu2 }
 0x212   : > { %4528 = vst [vmem:[#allocation9_spill] sm:$0xff] %v4073_v15 }
 0x216   : > { %v1184_v16 = vpop.f32.mrf.mxu3  ;;  %v4075_v17 = vpop.f32.mrf.mxu0 }
 0x217   : > { %4529 = vst [vmem:[#allocation10_spill] sm:$0xff] %v4075_v17  ;;  %v1287_v19 = vpop.f32.mrf.mxu1 }
 0x219   : > { %v1310_v35 = vpop.f32.mrf.mxu2 }
 0x21e   : > { %v4077_v25 = vpop.f32.mrf.mxu3  ;;  %v4079_v31 = vpop.f32.mrf.mxu0 }
 0x21f   : > { %4530 = vst [vmem:[#allocation11_spill] sm:$0xff] %v4077_v25  ;;  %v4081_v40 = vpop.f32.mrf.mxu1 }
 0x220   : > { %4531 = vst [vmem:[#allocation12_spill] sm:$0xff] %v4079_v31 }
 0x221   : > { %4532 = vst [vmem:[#allocation13_spill] sm:$0xff] %v4081_v40  ;;  %v1313_v13 = vpop.f32.mrf.mxu2  ;;  %v691_v40 = vadd.f32 %v690_v50, %v3987_v37 }
 0x226   : > { %v4083_v45 = vpop.f32.mrf.mxu3  ;;  %v4085_v21 = vpop.f32.mrf.mxu0 }
 0x227   : > { %4533 = vst [vmem:[#allocation14_spill] sm:$0xff] %v4083_v45  ;;  %v4087_v9 = vpop.f32.mrf.mxu1  ;;  %v665_v45 = vadd.f32 %v4005_v44, %v3985_v36 }
 0x228   : > { %4534 = vst [vmem:[#allocation15_spill] sm:$0xff] %v4085_v21 }
 0x229   : > { %4535 = vst [vmem:[#allocation16_spill] sm:$0xff] %v4087_v9  ;;  %v4091_v17 = vpop.f32.mrf.mxu2  ;;  %v659_v9 = vadd.f32 %v3976_v33, %v3953_v22  ;;  %v845_v21 = vadd.f32 %v784_v52, %v665_v45  ;;  %v4550_v45 = vld [vmem:[#allocation13_spill] sm:$0xff] }
 0x22a   : > { %4537 = vst [vmem:[#allocation18_spill] sm:$0xff] %v4091_v17  ;;  %v688_v17 = vadd.f32 %v4013_v46, %v3969_v28 }
 0x22b   : > { %v839_v36 = vadd.f32 %v4003_v43, %v659_v9  ;;  %v974_v22 = vadd.f32 %v913_v27, %v845_v21  ;;  %v4543_v9 = vld [vmem:[#allocation9_spill] sm:$0xff] }
 0x22c   : > { %v843_v44 = vadd.f32 %v807_v53, %v688_v17 }
 0x22d   : > { %v1074_v21 = vadd.f32 %v1013_v34, %v974_v22  ;;  %v4541_v34 = vld [vmem:[#allocation5_spill] sm:$0xff] }
 0x22e   : > { %v4089_v2 = vpop.f32.mrf.mxu3  ;;  %v1416_v15 = vpop.f32.mrf.mxu0  ;;  %v972_v43 = vadd.f32 %v4035_v60, %v843_v44 }
 0x22f   : > { %4536 = vst [vmem:[#allocation17_spill] sm:$0xff] %v4089_v2  ;;  %v1442_v10 = vpop.f32.mrf.mxu1  ;;  %v662_v2 = vadd.f32 %v3991_v39, %v3967_v26  ;;  %v714_v26 = vadd.f32 %v4015_v47, %v3974_v32  ;;  %v1219_v53 = vadd.f32 %v1158_v11, %v1074_v21 }
 0x231   : > { %v842_v37 = vadd.f32 %v4017_v48, %v662_v2  ;;  %v4114_v50 = vpop.f32.mrf.mxu2  ;;  %v968_v48 = vadd.f32 %v4027_v55, %v839_v36  ;;  %v844_v32 = vadd.f32 %v4031_v58, %v714_v26  ;;  %v1348_v27 = vadd.f32 %v1287_v19, %v1219_v53  ;;  %v4557_v53 = vld [vmem:[#allocation18_spill] sm:$0xff] }
 0x236   : > { %v4093_v29 = vpop.f32.mrf.mxu3  ;;  %v4095_v25 = vpop.f32.mrf.mxu0  ;;  %v4551_v44 = vld [vmem:[#allocation17_spill] sm:$0xff] }
 0x237   : > { %4538 = vst [vmem:[#allocation19_spill] sm:$0xff] %v4093_v29  ;;  %v4097_v31 = vpop.f32.mrf.mxu1  ;;  %v846_v29 = vadd.f32 %v810_v57, %v691_v40 }
 0x238   : > { %4539 = vst [vmem:[#allocation20_spill] sm:$0xff] %v4095_v25  ;;  %v685_v25 = vadd.f32 %v3999_v41, %v3956_v23  ;;  %v717_v23 = vadd.f32 %v4023_v51, %v3989_v38  ;;  %v1072_v51 = vadd.f32 %v4053_v4, %v972_v43 }
 0x239   : > { %4540 = vst [vmem:[#allocation21_spill] sm:$0xff] %v4097_v31  ;;  %v711_v31 = vadd.f32 %v4001_v42, %v3958_v24  ;;  %v975_v33 = vadd.f32 %v939_v62, %v846_v29  ;;  %v971_v42 = vadd.f32 %v4033_v59, %v842_v37  ;;  %v1068_v59 = vadd.f32 %v4043_v0, %v968_v48  ;;  %v1468_v37 = vpop.f32.mrf.mxu2 }
 0x23a   : > { %v840_v28 = vadd.f32 %v4019_v49, %v685_v25  ;;  %v847_v47 = vadd.f32 %v4039_v61, %v717_v23  ;;  %v1217_v58 = vadd.f32 %v1181_v12, %v1072_v51  ;;  %v973_v62 = vadd.f32 %v4041_v63, %v844_v32  ;;  %v4544_v12 = vld [vmem:[#allocation10_spill] sm:$0xff] }
 0x23b   : > { %v841_v39 = vadd.f32 %v4025_v54, %v711_v31  ;;  %v1075_v46 = vadd.f32 %v1039_v5, %v975_v33  ;;  %v1071_v38 = vadd.f32 %v4051_v3, %v971_v42  ;;  %v1213_v2 = vadd.f32 %v4057_v30, %v1068_v59  ;;  %v4542_v5 = vld [vmem:[#allocation7_spill] sm:$0xff] }
 0x23c   : > { %v969_v52 = vadd.f32 %v4029_v56, %v840_v28  ;;  %v976_v55 = vadd.f32 %v4049_v20, %v847_v47  ;;  %v1346_v0 = vadd.f32 %v1310_v35, %v1217_v58  ;;  %v1477_v29 = vadd.f32 %v1416_v15, %v1348_v27  ;;  %v4545_v30 = vld [vmem:[#allocation15_spill] sm:$0xff]  ;;  %v4548_v15 = vld [vmem:[#allocation8_spill] sm:$0xff]  ;;  %v4552_v28 = vld [vmem:[#allocation6_spill] sm:$0xff] }
 0x23d   : > { %v1220_v54 = vadd.f32 %v1184_v16, %v1075_v46  ;;  %v970_v57 = vadd.f32 %v4037_v18, %v841_v39  ;;  %v1216_v56 = vadd.f32 %v4061_v7, %v1071_v38  ;;  %v1073_v20 = vadd.f32 %v4541_v34, %v973_v62  ;;  %v4549_v35 = vld [vmem:[#allocation12_spill] sm:$0xff]  ;;  %v4553_v39 = vld [vmem:[#allocation14_spill] sm:$0xff] }
 0x23e   : > { %v1542_v24 = vpop.f32.mrf.mxu3  ;;  %v1568_v41 = vpop.f32.mrf.mxu0  ;;  %v1069_v60 = vadd.f32 %v4045_v1, %v969_v52  ;;  %v1076_v3 = vadd.f32 %v4059_v6, %v976_v55  ;;  %v1342_v7 = vadd.f32 %v4542_v5, %v1213_v2  ;;  %v4546_v6 = vld [vmem:[#allocation16_spill] sm:$0xff]  ;;  %v4554_v21 = vld [vmem:[#allocation19_spill] sm:$0xff]  ;;  %v4559_v2 = vmov 0.0  }
 0x23f   : > { %v1594_v49 = vpop.f32.mrf.mxu1  ;;  %v1349_v61 = vadd.f32 %v1313_v13, %v1220_v54  ;;  %v1345_v18 = vadd.f32 %v4071_v14, %v1216_v56  ;;  %v1475_v19 = vadd.f32 %v4546_v6, %v1346_v0  ;;  %v4547_v14 = vld [vmem:[#allocation4_spill] sm:$0xff] }
 0x240   : > { %v1214_v4 = vadd.f32 %v4063_v8, %v1069_v60  ;;  %v1221_v13 = vadd.f32 %v4544_v12, %v1076_v3  ;;  %v1070_v31 = vadd.f32 %v4547_v14, %v970_v57  ;;  %v1471_v40 = vadd.f32 %v4549_v35, %v1342_v7  ;;  %v4555_v48 = vld [vmem:[#allocation20_spill] sm:$0xff]  ;;  %v4558_v59 = vld [vmem:[#allocation21_spill] sm:$0xff] }
 0x241   : > { %v1478_v1 = vadd.f32 %v1442_v10, %v1349_v61  ;;  %v1474_v17 = vadd.f32 %v4545_v30, %v1345_v18  ;;  %v1218_v10 = vadd.f32 %v4548_v15, %v1073_v20  ;;  %v1604_v26 = vadd.f32 %v1568_v41, %v1475_v19  ;;  %v1609_v47 = vld [vmem:[%s4515_s5] sm:$0xff]  ;;  %v1610_v55 = vld [vmem:[%s4515_s5 + $0x8] sm:$0xff] }
 0x242   : > { %v1343_v11 = vadd.f32 %v4543_v9, %v1214_v4  ;;  %v1350_v22 = vadd.f32 %v4551_v44, %v1221_v13  ;;  %v1215_v23 = vadd.f32 %v4552_v28, %v1070_v31  ;;  %v1600_v46 = vadd.f32 %v4554_v21, %v1471_v40  ;;  %v1614_v4 = vld [vmem:[%s4516_s6 + $0x18] sm:$0xff]  ;;  %v1615_v18 = vld [vmem:[%s4516_s6 + $0x20] sm:$0xff]  ;;  %v1612_v9 = vld [vmem:[%s4516_s6 + $0x8] sm:$0xff] }
 0x243   : > { %v1603_v33 = vadd.f32 %v1542_v24, %v1474_v17  ;;  %v1347_v42 = vadd.f32 %v4553_v39, %v1218_v10  ;;  %v4556_v24 = vld [vmem:[#allocation11_spill] sm:$0xff]  ;;  %v1613_v13 = vld [vmem:[%s4516_s6 + $0x10] sm:$0xff] }
 0x244   : > { %v1472_v36 = vadd.f32 %v4550_v45, %v1343_v11  ;;  %v1479_v32 = vadd.f32 %v1468_v37, %v1350_v22  ;;  %v1344_v41 = vadd.f32 %v4556_v24, %v1215_v23 }
 0x245   : > { %v1476_v38 = vadd.f32 %v4114_v50, %v1347_v42  ;;  %v1692_v50 = vld [vmem:[%s4510_s0] sm:$0x7] }
 0x246   : > { %v1545_v63 = vpop.f32.mrf.mxu3  ;;  %v1571_v16 = vpop.f32.mrf.mxu0  ;;  %v1601_v52 = vadd.f32 %v4555_v48, %v1472_v36  ;;  %v1473_v54 = vadd.f32 %v4557_v53, %v1344_v41  ;;  %v1694_v56 = vperm.slane %v1692_v50, 0 }
 0x247   : > { %v1606_v8 = vadd.f32 %v1545_v63, %v1477_v29  ;;  %v1607_v25 = vadd.f32 %v1571_v16, %v1478_v1  ;;  %v1597_v43 = vpop.f32.mrf.mxu1  ;;  %v1605_v57 = vadd.f32 %v1594_v49, %v1476_v38  ;;  %v1611_v49 = vld [vmem:[%s4516_s6] sm:$0xff]  ;;  %v1695_v1 = vperm.slane %v1692_v50, 1 }
 0x248   : > { %v1608_v51 = vadd.f32 %v1597_v43, %v1479_v32  ;;  %v1602_v60 = vadd.f32 %v4558_v59, %v1473_v54  ;;  %v1696_v16 = vperm.slane %v1692_v50, 2  ;;  %v3112_v38 = vld [vmem:[%s4517_s7 + $0x20] sm:$0xff]  ;;  %v4275_v54 = vld [vmem:[%s4517_s7 + $0x28] sm:$0xff] }
 0x249   : > { %1636 = vmatpush.msrb.mxu2 %v1606_v8  ;;  %1659 = vmatpush.msrb.mxu3 %v1607_v25  ;;  %v1616_v25 = vld [vmem:[%s4516_s6 + $0x28] sm:$0xff] }
 0x24b   : > { %1637 = vmatpush.msrb.mxu2 %v1603_v33  ;;  %1660 = vmatpush.msrb.mxu3 %v1604_v26 }
 0x24d   : > { %1638 = vmatpush.msrb.mxu2 %v1600_v46  ;;  %1661 = vmatpush.msrb.mxu3 %v1601_v52  ;;  %v3111_v46 = vld [vmem:[%s4517_s7 + $0x18] sm:$0xff] }
 0x24e   : > { %3105 = vmatmul.msk.f32.vlgmr.msrb.gmra.mxu2 %vm381_vm0, %v1609_v47  ;;  %3107 = vmatmul.msk.f32.vlgmr.msrb.gmra.mxu3 %vm381_vm0, %v1609_v47 }
 0x24f   : > { %1682 = vmatpush.msra.mxu2 %v1608_v51 }
 0x251   : > { %1683 = vmatpush.msra.mxu2 %v1605_v57 }
 0x253   : > { %1684 = vmatpush.msra.mxu2 %v1602_v60 }
 0x256   : > { %3106 = vmatmul.msk.f32.gmra.mxu2 %vm381_vm0, %v1610_v55  ;;  %3108 = vmatmul.msk.f32.gmra.mxu3 %vm381_vm0, %v1610_v55 }
 0x25e   : > { %3109 = vmatmul.msk.f32.vlgmr.msra.gmra.mxu2 %vm381_vm0, %v1609_v47 }
 0x266   : > { %3110 = vmatmul.msk.f32.gmra.mxu2 %vm381_vm0, %v1610_v55 }
 0x2d1   : > { %v1640_v58 = vpop.f32.mrf.mxu2  ;;  %v1663_v27 = vpop.f32.mrf.mxu3 }
 0x2d2   : > { %v1641_v61 = vadd.f32 %v1640_v58, %v1611_v49  ;;  %v1664_v63 = vadd.f32 %v1663_v27, %v1612_v9 }
 0x2d4   : > { %v4177_v62 = vmul.f32 %v1694_v56, %v1641_v61  ;;  %v4204_v6 = vmul.f32 %v1695_v1, %v1664_v63 }
 0x2d6   : > { %v3406_v3 = vpack.i.bf16 %v4177_v62, %v4559_v2  ;;  %v3426_v40 = vpack.i.bf16 %v4204_v6, %v4177_v62 }
 0x2d8   : > { %3407 = vrot.lane.b32.xlu0 %v3406_v3, %s3572_s12 }
 0x2d9   : > { %v1643_v0 = vpop.f32.mrf.mxu2  ;;  %v1666_v29 = vpop.f32.mrf.mxu3 }
 0x2da   : > { %v1644_v34 = vadd.f32 %v1643_v0, %v1614_v4  ;;  %v1667_v20 = vadd.f32 %v1666_v29, %v1615_v18 }
 0x2dc   : > { %v4188_v5 = vmul.f32 %v1694_v56, %v1644_v34  ;;  %v4190_v7 = vmul.f32 %v1695_v1, %v1667_v20 }
 0x2de   : > { %v3401_v11 = vpack.i.bf16 %v4188_v5, %v4559_v2  ;;  %v3421_v12 = vpack.i.bf16 %v4190_v7, %v4188_v5  ;;  %v3466_v45 = vpack.i.bf16 0.0, %v4190_v7  ;;  %v3491_v36 = vpack.i.bf16 %v4177_v62, %v4188_v5 }
 0x2e0   : > { %3402 = vrot.lane.b32.xlu2 %v3401_v11, %s3572_s12  ;;  %3422 = vrot.lane.b32.xlu0 %v3421_v12, %s3573_s9 }
 0x2e1   : > { %v1686_v30 = vpop.f32.mrf.mxu2 }
 0x2e2   : > { %v1687_v17 = vadd.f32 %v1686_v30, %v1613_v13 }
 0x2e4   : > { %v4206_v19 = vmul.f32 %v1696_v16, %v1687_v17 }
 0x2e6   : > { %v3416_v8 = vpack.i.bf16 %v4206_v19, %v4204_v6  ;;  %v3516_v22 = vpack.i.bf16 0.0, %v4206_v19 }
 0x2e8   : > { %3417 = vrot.lane.b32.xlu2 %v3416_v8, %s3572_s12 }
 0x2e9   : > { %v1689_v14 = vpop.f32.mrf.mxu2 }
 0x2ea   : > { %v1690_v31 = vadd.f32 %v1689_v14, %v1616_v25 }
 0x2ec   : > { %v4214_v15 = vmul.f32 %v1696_v16, %v1690_v31  ;;  %v1720_v16 = vld [vmem:[%s4517_s7] sm:$0xff] }
 0x2ee   : > { %v3411_v10 = vpack.i.bf16 %v4214_v15, %v4190_v7  ;;  %v3436_v35 = vpack.i.bf16 %v4206_v19, %v4214_v15  ;;  %v3511_v37 = vpack.i.bf16 0.0, %v4214_v15  ;;  %v3526_v44 = vpack.i.bf16 %v4177_v62, %v4214_v15 }
 0x2f0   : > { %3412 = vrot.lane.b32.xlu1 %v3411_v10, %s3572_s12  ;;  %3432 = vrot.lane.b32.xlu2 %v4559_v2, %s3573_s9 }
 0x2f1   : > { %3437 = vrot.lane.b32.xlu0 %v3436_v35, %s3573_s9 }
 0x2f8   : > { %3447 = vrot.lane.b32.xlu2 %v3406_v3, %s3574_s19  ;;  %3427 = vrot.lane.b32.xlu1 %v3426_v40, %s3573_s9 }
 0x2f9   : > { %3452 = vrot.lane.b32.xlu0 %v3411_v10, %s3574_s19 }
 0x300   : > { %3462 = vrot.lane.b32.xlu2 %v3401_v11, %s3575_s20  ;;  %3442 = vrot.lane.b32.xlu1 %v3401_v11, %s3574_s19 }
 0x301   : > { %3467 = vrot.lane.b32.xlu0 %v3466_v45, %s3575_s20 }
 0x308   : > { %3477 = vrot.lane.b32.xlu2 %v3436_v35, %s3575_s20  ;;  %3457 = vrot.lane.b32.xlu1 %v3416_v8, %s3574_s19  ;;  %s359_s19 = scalar_lea.vmem %s4520_s10, %s3222_s30 }
 0x309   : > { %3482 = vrot.lane.b32.xlu0 %v3411_v10, %s3576_s21 }
 0x310   : > { %3492 = vrot.lane.b32.xlu2 %v3491_v36, %s3576_s21  ;;  %3472 = vrot.lane.b32.xlu1 %v3426_v40, %s3575_s20 }
 0x311   : > { %3497 = vrot.lane.b32.xlu0 %v4559_v2, %s3576_s21 }
 0x318   : > { %3507 = vrot.lane.b32.xlu2 %v3426_v40, %s3577_s22  ;;  %3487 = vrot.lane.b32.xlu1 %v3416_v8, %s3576_s21 }
 0x319   : > { %3512 = vrot.lane.b32.xlu0 %v3511_v37, %s3577_s22 }
 0x320   : > { %3522 = vrot.lane.b32.xlu2 %v3421_v12, %s3578_s23  ;;  %3502 = vrot.lane.b32.xlu1 %v3421_v12, %s3577_s22 }
 0x321   : > { %3527 = vrot.lane.b32.xlu0 %v3526_v44, %s3578_s23  ;;  %v1721_v44 = vld [vmem:[%s4517_s7 + $0x8] sm:$0xff] }
 0x328   : > { %3537 = vrot.lane.b32.xlu2 %v3421_v12, %s3579_s24  ;;  %3517 = vrot.lane.b32.xlu1 %v3516_v22, %s3577_s22 }
 0x329   : > { %3542 = vrot.lane.b32.xlu0 %v3426_v40, %s3579_s24 }
 0x330   : > { %3552 = vrot.lane.b32.xlu2 %v3511_v37, %s3579_s24  ;;  %3532 = vrot.lane.b32.xlu1 %v3416_v8, %s3578_s23 }
 0x331   : > { %3557 = vrot.lane.b32.xlu0 %v3516_v22, %s3579_s24 }
 0x338   : > { %3547 = vrot.lane.b32.xlu1 %v4559_v2, %s3578_s23 }
 0x33a   : > { %v3403_v33 = vpop.permute.xlu2 %3402 }
 0x33b   : > { %v3405_v26 = vunpack.i.h.bf16 %v3403_v33  ;;  %v3404_v28 = vunpack.i.l.bf16 %v3403_v33 }
 0x33d   : > { %v1754_v23 = vsel %vm502_vm1, %v3404_v28, %v3405_v26 }
 0x33e   : > { %1786 = vmatpush.msra.mxu3 %v1754_v23 }
 0x342   : > { %v3418_v39 = vpop.permute.xlu2 %3417 }
 0x343   : > { %v3420_v60 = vunpack.i.h.bf16 %v3418_v39  ;;  %v3419_v55 = vunpack.i.l.bf16 %v3418_v39 }
 0x345   : > { %v1753_v4 = vsel %vm502_vm1, %v3419_v55, %v3420_v60 }
 0x34a   : > { %v3408_v42 = vpop.permute.xlu0 %3407  ;;  %v3433_v52 = vpop.permute.xlu2 %3432 }
 0x34b   : > { %v3410_v43 = vunpack.i.h.bf16 %v3408_v42  ;;  %v3409_v21 = vunpack.i.l.bf16 %v3408_v42  ;;  %v3434_v32 = vunpack.i.l.bf16 %v3433_v52  ;;  %v3435_v18 = vunpack.i.h.bf16 %v3433_v52 }
 0x34d   : > { %v1751_v48 = vsel %vm502_vm1, %v3409_v21, %v3410_v43  ;;  %v1752_v3 = vsel %vm502_vm1, %v3410_v43, %v3419_v55  ;;  %v1722_v21 = vld [vmem:[%s4517_s7 + $0x10] sm:$0xff] }
 0x34e   : > { %1787 = vmatpush.msra.mxu3 %v1751_v48 }
 0x34f   : > { %3114 = vmatmul.msk.f32.vlgmr.msra.gmra.mxu3 %vm515_vm2, %v3111_v46 }
 0x352   : > { %v3423_v47 = vpop.permute.xlu0 %3422  ;;  %v4277_v57 = vpop.permute.xlu2 %3447 }
 0x353   : > { %v3425_v24 = vunpack.i.h.bf16 %v3423_v47  ;;  %v3424_v41 = vunpack.i.l.bf16 %v3423_v47  ;;  %v3450_v10 = vunpack.i.h.bf16 %v4277_v57  ;;  %v3449_v35 = vunpack.i.l.bf16 %v4277_v57  ;;  %v3132_v47 = vld [vmem:[%s4517_s7 + $0x30] sm:$0xff] }
 0x355   : > { %v1869_v51 = vsel %vm619_vm3, %v3434_v32, %v3424_v41  ;;  %v1870_v53 = vsel %vm619_vm3, %v3424_v41, %v3425_v24 }
 0x356   : > { %1901 = vmatpush.msrb.mxu2 %v1869_v51  ;;  %1927 = vmatpush.msrb.mxu3 %v1870_v53 }
 0x357   : > { %3115 = vmatmul.msk.f32.gmra.mxu3 %vm515_vm2, %v3112_v38 }
 0x35a   : > { %v3463_v2 = vpop.permute.xlu2 %3462 }
 0x35b   : > { %v3465_v29 = vunpack.i.h.bf16 %v3463_v2  ;;  %v3464_v34 = vunpack.i.l.bf16 %v3463_v2 }
 0x35d   : > { %v2116_v14 = vsel %vm868_vm5, %v3464_v34, %v3465_v29  ;;  %v3144_v34 = vld [vmem:[%s4517_s7 + $0x48] sm:$0xff] }
 0x35f   : > { %3116 = vmatmul.msk.f32.gmra.mxu3 %vm515_vm2, %v4275_v54 }
 0x362   : > { %v3413_v59 = vpop.permute.xlu1 %3412  ;;  %v3478_v23 = vpop.permute.xlu2 %3477 }
 0x363   : > { %v3415_v50 = vunpack.i.h.bf16 %v3413_v59  ;;  %v3414_v49 = vunpack.i.l.bf16 %v3413_v59  ;;  %v3438_v56 = vpop.permute.xlu0 %3437 }
 0x364   : > { %v3439_v58 = vunpack.i.l.bf16 %v3438_v56  ;;  %v3440_v20 = vunpack.i.h.bf16 %v3438_v56  ;;  %v3133_v56 = vld [vmem:[%s4517_s7 + $0x38] sm:$0xff] }
 0x365   : > { %v1755_v27 = vsel %vm502_vm1, %v3405_v26, %v3414_v49  ;;  %v1756_v61 = vsel %vm502_vm1, %v3414_v49, %v3415_v50  ;;  %v1985_v26 = vsel %vm739_vm4, %v3449_v35, %v3450_v10  ;;  %v3145_v35 = vld [vmem:[%s4517_s7 + $0x50] sm:$0xff] }
 0x366   : > { %1812 = vmatpush.msra.mxu0 %v1755_v27  ;;  %1838 = vmatpush.msra.mxu1 %v1756_v61  ;;  %v1871_v0 = vsel %vm619_vm3, %v3425_v24, %v3439_v58 }
 0x368   : > { %1813 = vmatpush.msra.mxu0 %v1752_v3  ;;  %1839 = vmatpush.msra.mxu1 %v1753_v4 }
 0x369   : > { %3117 = vmatmul.msk.f32.vlgmr.msra.gmra.mxu0 %vm515_vm2, %v3111_v46  ;;  %3120 = vmatmul.msk.f32.vlgmr.msra.gmra.mxu1 %vm515_vm2, %v3111_v46  ;;  %v3479_v46 = vunpack.i.l.bf16 %v3478_v23 }
 0x36a   : > { %1953 = vmatpush.msrb.mxu0 %v1871_v0  ;;  %v3428_v1 = vpop.permute.xlu1 %3427  ;;  %v3493_v51 = vpop.permute.xlu2 %3492 }
 0x36b   : > { %v3430_v9 = vunpack.i.h.bf16 %v3428_v1  ;;  %v3429_v11 = vunpack.i.l.bf16 %v3428_v1  ;;  %v3453_v12 = vpop.permute.xlu0 %3452  ;;  %v3494_v49 = vunpack.i.l.bf16 %v3493_v51 }
 0x36c   : > { %v3455_v13 = vunpack.i.h.bf16 %v3453_v12  ;;  %v3454_v63 = vunpack.i.l.bf16 %v3453_v12 }
 0x36d   : > { %v1866_v30 = vsel %vm619_vm3, %v3435_v18, %v3429_v11  ;;  %v1867_v17 = vsel %vm619_vm3, %v3429_v11, %v3430_v9  ;;  %v1868_v8 = vsel %vm619_vm3, %v3430_v9, %v3440_v20  ;;  %v3134_v18 = vld [vmem:[%s4517_s7 + $0x40] sm:$0xff] }
 0x36e   : > { %1902 = vmatpush.msrb.mxu2 %v1866_v30  ;;  %1928 = vmatpush.msrb.mxu3 %v1867_v17  ;;  %v1990_v25 = vsel %vm739_vm4, %v3454_v63, %v3455_v13 }
 0x36f   : > { %1954 = vmatpush.msrb.mxu0 %v1868_v8  ;;  %3123 = vmatmul.msk.f32.vlgmr.msrb.gmra.mxu2 %vm515_vm2, %v1720_v16 }
 0x370   : > { %3126 = vmatmul.msk.f32.vlgmr.msrb.gmra.mxu3 %vm515_vm2, %v1720_v16 }
 0x371   : > { %2148 = vmatpush.msra.mxu0 %v2116_v14  ;;  %2072 = vmatpush.msra.mxu3 %v1990_v25  ;;  %v3156_v14 = vld [vmem:[%s4517_s7 + $0x60] sm:$0xff] }
 0x372   : > { %3118 = vmatmul.msk.f32.gmra.mxu0 %vm515_vm2, %v3112_v38  ;;  %3121 = vmatmul.msk.f32.gmra.mxu1 %vm515_vm2, %v3112_v38  ;;  %v3443_v31 = vpop.permute.xlu1 %3442  ;;  %v3480_v38 = vunpack.i.h.bf16 %v3478_v23  ;;  %v3158_v23 = vld [vmem:[%s4517_s7 + $0x70] sm:$0xff] }
 0x373   : > { %v3445_v40 = vunpack.i.h.bf16 %v3443_v31  ;;  %v3444_v45 = vunpack.i.l.bf16 %v3443_v31  ;;  %v3468_v36 = vpop.permute.xlu0 %3467 }
 0x374   : > { %v3469_v37 = vunpack.i.l.bf16 %v3468_v36  ;;  %v3470_v53 = vunpack.i.h.bf16 %v3468_v36 }
 0x375   : > { %v1988_v22 = vsel %vm739_vm4, %v3444_v45, %v3445_v40  ;;  %v1989_v33 = vsel %vm739_vm4, %v3445_v40, %v3454_v63 }
 0x376   : > { %2020 = vmatpush.msrb.mxu1 %v1988_v22  ;;  %2046 = vmatpush.msra.mxu2 %v1989_v33  ;;  %v2117_v28 = vsel %vm868_vm5, %v3465_v29, %v3469_v37  ;;  %v2118_v32 = vsel %vm868_vm5, %v3469_v37, %v3479_v46 }
 0x377   : > { %3124 = vmatmul.msk.f32.gmra.mxu2 %vm515_vm2, %v1721_v44 }
 0x378   : > { %3127 = vmatmul.msk.f32.gmra.mxu3 %vm515_vm2, %v1721_v44  ;;  %2021 = vmatpush.msrb.mxu1 %v1985_v26  ;;  %v3146_v26 = vld [vmem:[%s4517_s7 + $0x58] sm:$0xff] }
 0x37a   : > { %3119 = vmatmul.msk.f32.gmra.mxu0 %vm515_vm2, %v4275_v54  ;;  %2174 = vmatpush.msra.mxu1 %v2117_v28  ;;  %v3458_v39 = vpop.permute.xlu1 %3457 }
 0x37b   : > { %3122 = vmatmul.msk.f32.gmra.mxu1 %vm515_vm2, %v4275_v54  ;;  %v3460_v42 = vunpack.i.h.bf16 %v3458_v39  ;;  %v3459_v43 = vunpack.i.l.bf16 %v3458_v39  ;;  %v3483_v24 = vpop.permute.xlu0 %3482 }
 0x37c   : > { %v3484_v57 = vunpack.i.l.bf16 %v3483_v24  ;;  %v3485_v59 = vunpack.i.h.bf16 %v3483_v24 }
 0x37d   : > { %v1986_v48 = vsel %vm739_vm4, %v3450_v10, %v3459_v43  ;;  %v1987_v52 = vsel %vm739_vm4, %v3459_v43, %v3460_v42 }
 0x37e   : > { %2047 = vmatpush.msra.mxu2 %v1986_v48  ;;  %2073 = vmatpush.msra.mxu3 %v1987_v52  ;;  %v2361_v58 = vsel %vm1113_vm6, %v3484_v57, %v3485_v59 }
 0x37f   : > { %3125 = vmatmul.msk.f32.gmra.mxu2 %vm515_vm2, %v1722_v21 }
 0x380   : > { %2248 = vmatpush.msrb.mxu3 %v4188_v5  ;;  %2200 = vmatpush.msrb.mxu2 %v2118_v32 }
 0x381   : > { %3128 = vmatmul.msk.f32.gmra.mxu3 %vm515_vm2, %v1722_v21 }
 0x382   : > { %3129 = vmatmul.msk.f32.vlgmr.msrb.gmra.mxu0 %vm515_vm2, %v1720_v16  ;;  %2249 = vmatpush.msrb.mxu3 %v4177_v62  ;;  %v3473_v41 = vpop.permute.xlu1 %3472  ;;  %v2360_v62 = vsel %vm1113_vm6, %v3494_v49, %v3484_v57  ;;  %v3168_v57 = vld [vmem:[%s4517_s7 + $0x78] sm:$0xff] }
 0x383   : > { %3135 = vmatmul.msk.f32.vlgmr.msrb.gmra.mxu1 %vm515_vm2, %v3132_v47  ;;  %v3475_v54 = vunpack.i.h.bf16 %v3473_v41  ;;  %v3474_v5 = vunpack.i.l.bf16 %v3473_v41  ;;  %v3498_v4 = vpop.permute.xlu0 %3497 }
 0x384   : > { %v3499_v0 = vunpack.i.l.bf16 %v3498_v4  ;;  %v3500_v20 = vunpack.i.h.bf16 %v3498_v4  ;;  %v3180_v4 = vld [vmem:[%s4517_s7 + $0x90] sm:$0xff] }
 0x385   : > { %v2113_v60 = vsel %vm868_vm5, %v3470_v53, %v3474_v5  ;;  %v2114_v55 = vsel %vm868_vm5, %v3474_v5, %v3475_v54  ;;  %v2115_v50 = vsel %vm868_vm5, %v3475_v54, %v3480_v38 }
 0x386   : > { %2149 = vmatpush.msra.mxu0 %v2113_v60  ;;  %2175 = vmatpush.msra.mxu1 %v2114_v55  ;;  %v2362_v13 = vsel %vm1113_vm6, %v3485_v59, %v3499_v0 }
 0x387   : > { %2201 = vmatpush.msrb.mxu2 %v2115_v50 }
 0x388   : > { %2274 = vmatpush.msrb.mxu0 %v4190_v7  ;;  %3138 = vmatmul.msk.f32.vlgmr.msra.gmra.mxu2 %vm515_vm2, %v3132_v47  ;;  %v3495_v7 = vunpack.i.h.bf16 %v3493_v51 }
 0x389   : > { %3141 = vmatmul.msk.f32.vlgmr.msra.gmra.mxu3 %vm515_vm2, %v3132_v47  ;;  %2300 = vmatpush.msrb.mxu1 %v4214_v15 }
 0x38a   : > { %2392 = vmatpush.msra.mxu2 %v2360_v62  ;;  %2418 = vmatpush.msra.mxu3 %v2361_v58  ;;  %v3488_v27 = vpop.permute.xlu1 %3487  ;;  %v3169_v58 = vld [vmem:[%s4517_s7 + $0x80] sm:$0xff] }
 0x38b   : > { %3130 = vmatmul.msk.f32.gmra.mxu0 %vm515_vm2, %v1721_v44  ;;  %3136 = vmatmul.msk.f32.gmra.mxu1 %vm515_vm2, %v3133_v56  ;;  %v3490_v61 = vunpack.i.h.bf16 %v3488_v27  ;;  %v3489_v2 = vunpack.i.l.bf16 %v3488_v27  ;;  %v3513_v12 = vpop.permute.xlu0 %3512  ;;  %v3157_v44 = vld [vmem:[%s4517_s7 + $0x68] sm:$0xff] }
 0x38c   : > { %2275 = vmatpush.msrb.mxu0 %v4204_v6  ;;  %2301 = vmatpush.msrb.mxu1 %v4206_v19  ;;  %v3508_v19 = vpop.permute.xlu2 %3507  ;;  %v3515_v30 = vunpack.i.h.bf16 %v3513_v12  ;;  %v3514_v17 = vunpack.i.l.bf16 %v3513_v12  ;;  %v3204_v12 = vld [vmem:[%s4517_s7 + $0xc0] sm:$0xff] }
 0x38d   : > { %v2357_v3 = vsel %vm1113_vm6, %v3495_v7, %v3489_v2  ;;  %v2358_v15 = vsel %vm1113_vm6, %v3489_v2, %v3490_v61  ;;  %v3510_v9 = vunpack.i.h.bf16 %v3508_v19  ;;  %v3509_v11 = vunpack.i.l.bf16 %v3508_v19 }
 0x38e   : > { %2393 = vmatpush.msra.mxu2 %v2357_v3  ;;  %2419 = vmatpush.msra.mxu3 %v2358_v15  ;;  %v2359_v8 = vsel %vm1113_vm6, %v3490_v61, %v3500_v20  ;;  %v2490_v45 = vsel %vm1242_vm7, %v3514_v17, %v3515_v30  ;;  %v3170_v61 = vld [vmem:[%s4517_s7 + $0x88] sm:$0xff]  ;;  %v3182_v20 = vld [vmem:[%s4517_s7 + $0xa0] sm:$0xff] }
 0x38f   : > { %v2485_v25 = vsel %vm1242_vm7, %v3509_v11, %v3510_v9 }
 0x390   : > { %3139 = vmatmul.msk.f32.gmra.mxu2 %vm515_vm2, %v3133_v56 }
 0x391   : > { %3142 = vmatmul.msk.f32.gmra.mxu3 %vm515_vm2, %v3133_v56 }
 0x392   : > { %v3503_v6 = vpop.permute.xlu1 %3502 }
 0x393   : > { %3131 = vmatmul.msk.f32.gmra.mxu0 %vm515_vm2, %v1722_v21  ;;  %3137 = vmatmul.msk.f32.gmra.mxu1 %vm515_vm2, %v3134_v18  ;;  %v3505_v29 = vunpack.i.h.bf16 %v3503_v6  ;;  %v3504_v1 = vunpack.i.l.bf16 %v3503_v6  ;;  %v3528_v28 = vpop.permute.xlu0 %3527 }
 0x394   : > { %v3523_v22 = vpop.permute.xlu2 %3522  ;;  %v3529_v43 = vunpack.i.l.bf16 %v3528_v28  ;;  %v3530_v32 = vunpack.i.h.bf16 %v3528_v28 }
 0x395   : > { %v2488_v63 = vsel %vm1242_vm7, %v3504_v1, %v3505_v29  ;;  %v2489_v40 = vsel %vm1242_vm7, %v3505_v29, %v3514_v17  ;;  %v3525_v39 = vunpack.i.h.bf16 %v3523_v22  ;;  %v3524_v42 = vunpack.i.l.bf16 %v3523_v22  ;;  %v3181_v1 = vld [vmem:[%s4517_s7 + $0x98] sm:$0xff]  ;;  %v3205_v17 = vld [vmem:[%s4517_s7 + $0xc8] sm:$0xff] }
 0x397   : > { %v2616_v47 = vsel %vm1371_vm8, %v3524_v42, %v3525_v39  ;;  %v2617_v24 = vsel %vm1371_vm8, %v3525_v39, %v3529_v43 }
 0x398   : > { %3140 = vmatmul.msk.f32.gmra.mxu2 %vm515_vm2, %v3134_v18 }
 0x399   : > { %3143 = vmatmul.msk.f32.gmra.mxu3 %vm515_vm2, %v3134_v18 }
 0x39a   : > { %v3518_v16 = vpop.permute.xlu1 %3517 }
 0x39b   : > { %3147 = vmatmul.msk.f32.vlgmr.msra.gmra.mxu0 %vm515_vm2, %v3144_v34  ;;  %3150 = vmatmul.msk.f32.vlgmr.msra.gmra.mxu1 %vm515_vm2, %v3144_v34  ;;  %v3519_v31 = vunpack.i.l.bf16 %v3518_v16  ;;  %v3520_v10 = vunpack.i.h.bf16 %v3518_v16  ;;  %v3543_v51 = vpop.permute.xlu0 %3542  ;;  %v3193_v16 = vld [vmem:[%s4517_s7 + $0xb0] sm:$0xff] }
 0x39c   : > { %2444 = vmatpush.msra.mxu0 %v2362_v13  ;;  %2520 = vmatpush.msra.mxu1 %v2488_v63  ;;  %v3538_v46 = vpop.permute.xlu2 %3537  ;;  %v3545_v60 = vunpack.i.h.bf16 %v3543_v51  ;;  %v3544_v55 = vunpack.i.l.bf16 %v3543_v51 }
 0x39d   : > { %v2486_v36 = vsel %vm1242_vm7, %v3510_v9, %v3519_v31  ;;  %v2487_v37 = vsel %vm1242_vm7, %v3519_v31, %v3520_v10  ;;  %v3540_v41 = vunpack.i.h.bf16 %v3538_v46  ;;  %v3539_v38 = vunpack.i.l.bf16 %v3538_v46  ;;  %v3192_v9 = vld [vmem:[%s4517_s7 + $0xa8] sm:$0xff] }
 0x39e   : > { %2445 = vmatpush.msra.mxu0 %v2359_v8  ;;  %2521 = vmatpush.msra.mxu1 %v2485_v25  ;;  %v2741_v56 = vsel %vm1500_vm9, %v3544_v55, %v3545_v60 }
 0x39f   : > { %v2744_v49 = vsel %vm1500_vm9, %v3539_v38, %v3540_v41 }
 0x3a0   : > { %3153 = vmatmul.msk.f32.vlgmr.msrb.gmra.mxu2 %vm515_vm2, %v3144_v34 }
 0x3a1   : > { %3159 = vmatmul.msk.f32.vlgmr.msrb.gmra.mxu3 %vm515_vm2, %v3156_v14  ;;  %2546 = vmatpush.msrb.mxu2 %v2489_v40 }
 0x3a2   : > { %2572 = vmatpush.msrb.mxu3 %v2490_v45  ;;  %v3533_v33 = vpop.permute.xlu1 %3532  ;;  %v3206_v45 = vld [vmem:[%s4517_s7 + $0xd0] sm:$0xff] }
 0x3a3   : > { %3148 = vmatmul.msk.f32.gmra.mxu0 %vm515_vm2, %v3145_v35  ;;  %3151 = vmatmul.msk.f32.gmra.mxu1 %vm515_vm2, %v3145_v35  ;;  %v3534_v21 = vunpack.i.l.bf16 %v3533_v33  ;;  %v3535_v48 = vunpack.i.h.bf16 %v3533_v33  ;;  %v3558_v7 = vpop.permute.xlu0 %3557 }
 0x3a4   : > { %2547 = vmatpush.msrb.mxu2 %v2486_v36  ;;  %2573 = vmatpush.msrb.mxu3 %v2487_v37  ;;  %v3553_v27 = vpop.permute.xlu2 %3552  ;;  %v3559_v15 = vunpack.i.l.bf16 %v3558_v7  ;;  %v3560_v18 = vunpack.i.h.bf16 %v3558_v7 }
 0x3a5   : > { %v2613_v54 = vsel %vm1371_vm8, %v3530_v32, %v3534_v21  ;;  %v2614_v5 = vsel %vm1371_vm8, %v3534_v21, %v3535_v48  ;;  %v3554_v2 = vunpack.i.l.bf16 %v3553_v27  ;;  %v3555_v3 = vunpack.i.h.bf16 %v3553_v27 }
 0x3a6   : > { %v2742_v0 = vsel %vm1500_vm9, %v3545_v60, %v3559_v15  ;;  %v2743_v29 = vsel %vm1500_vm9, %v3559_v15, %v3560_v18 }
 0x3a7   : > { %v2745_v6 = vsel %vm1500_vm9, %v3540_v41, %v3554_v2  ;;  %v2746_v19 = vsel %vm1500_vm9, %v3554_v2, %v3555_v3 }
 0x3a8   : > { %3154 = vmatmul.msk.f32.gmra.mxu2 %vm515_vm2, %v3145_v35 }
 0x3a9   : > { %3160 = vmatmul.msk.f32.gmra.mxu3 %vm515_vm2, %v3157_v44 }
 0x3aa   : > { %v3548_v52 = vpop.permute.xlu1 %3547 }
 0x3ab   : > { %3149 = vmatmul.msk.f32.gmra.mxu0 %vm515_vm2, %v3146_v26  ;;  %3152 = vmatmul.msk.f32.gmra.mxu1 %vm515_vm2, %v3146_v26  ;;  %v3549_v53 = vunpack.i.l.bf16 %v3548_v52  ;;  %v3550_v59 = vunpack.i.h.bf16 %v3548_v52 }
 0x3ad   : > { %v2618_v50 = vsel %vm1371_vm8, %v3529_v43, %v3549_v53  ;;  %v2615_v62 = vsel %vm1371_vm8, %v3535_v48, %v3550_v59 }
 0x3b0   : > { %3155 = vmatmul.msk.f32.gmra.mxu2 %vm515_vm2, %v3146_v26 }
 0x3b1   : > { %3161 = vmatmul.msk.f32.gmra.mxu3 %vm515_vm2, %v3158_v23 }
 0x3b3   : > { %3162 = vmatmul.msk.f32.vlgmr.msrb.gmra.mxu0 %vm515_vm2, %v3156_v14  ;;  %3165 = vmatmul.msk.f32.vlgmr.msrb.gmra.mxu1 %vm515_vm2, %v3156_v14  ;;  %v3194_v14 = vld [vmem:[%s4517_s7 + $0xb8] sm:$0xff] }
 0x3b4   : > { %2648 = vmatpush.msrb.mxu0 %v2616_v47  ;;  %2674 = vmatpush.msrb.mxu1 %v2617_v24 }
 0x3b6   : > { %2649 = vmatpush.msrb.mxu0 %v2613_v54  ;;  %2675 = vmatpush.msrb.mxu1 %v2614_v5 }
 0x3b8   : > { %3171 = vmatmul.msk.f32.vlgmr.msra.gmra.mxu2 %vm515_vm2, %v3168_v57 }
 0x3b9   : > { %3174 = vmatmul.msk.f32.vlgmr.msra.gmra.mxu3 %vm515_vm2, %v3168_v57  ;;  %2700 = vmatpush.msra.mxu2 %v2618_v50 }
 0x3ba   : > { %2776 = vmatpush.msra.mxu3 %v2744_v49 }
 0x3bb   : > { %3163 = vmatmul.msk.f32.gmra.mxu0 %vm515_vm2, %v3157_v44  ;;  %3166 = vmatmul.msk.f32.gmra.mxu1 %vm515_vm2, %v3157_v44 }
 0x3bc   : > { %2701 = vmatpush.msra.mxu2 %v2615_v62  ;;  %2777 = vmatpush.msra.mxu3 %v2741_v56 }
 0x3c0   : > { %3172 = vmatmul.msk.f32.gmra.mxu2 %vm515_vm2, %v3169_v58 }
 0x3c1   : > { %3175 = vmatmul.msk.f32.gmra.mxu3 %vm515_vm2, %v3169_v58 }
 0x3c3   : > { %3164 = vmatmul.msk.f32.gmra.mxu0 %vm515_vm2, %v3158_v23  ;;  %3167 = vmatmul.msk.f32.gmra.mxu1 %vm515_vm2, %v3158_v23 }
 0x3c8   : > { %3173 = vmatmul.msk.f32.gmra.mxu2 %vm515_vm2, %v3170_v61 }
 0x3c9   : > { %3176 = vmatmul.msk.f32.gmra.mxu3 %vm515_vm2, %v3170_v61 }
 0x3cb   : > { %3177 = vmatmul.msk.f32.vlgmr.msra.gmra.mxu0 %vm515_vm2, %v3168_v57  ;;  %3183 = vmatmul.msk.f32.vlgmr.msra.gmra.mxu1 %vm515_vm2, %v3180_v4 }
 0x3cc   : > { %2802 = vmatpush.msra.mxu0 %v2745_v6  ;;  %2828 = vmatpush.msra.mxu1 %v2746_v19 }
 0x3ce   : > { %2803 = vmatpush.msra.mxu0 %v2742_v0  ;;  %2829 = vmatpush.msra.mxu1 %v2743_v29 }
 0x3d0   : > { %3186 = vmatmul.msk.f32.vlgmr.msrb.gmra.mxu2 %vm515_vm2, %v3180_v4 }
 0x3d1   : > { %3189 = vmatmul.msk.f32.vlgmr.msrb.gmra.mxu3 %vm515_vm2, %v3180_v4 }
 0x3d2   : > { %v1789_v34 = vpop.f32.mrf.mxu3 }
 0x3d3   : > { %3178 = vmatmul.msk.f32.gmra.mxu0 %vm515_vm2, %v3169_v58  ;;  %3184 = vmatmul.msk.f32.gmra.mxu1 %vm515_vm2, %v3181_v1 }
 0x3d8   : > { %3187 = vmatmul.msk.f32.gmra.mxu2 %vm515_vm2, %v3181_v1 }
 0x3d9   : > { %3190 = vmatmul.msk.f32.gmra.mxu3 %vm515_vm2, %v3181_v1 }
 0x3da   : > { %v1792_v11 = vpop.f32.mrf.mxu3 }
 0x3db   : > { %3179 = vmatmul.msk.f32.gmra.mxu0 %vm515_vm2, %v3170_v61  ;;  %3185 = vmatmul.msk.f32.gmra.mxu1 %vm515_vm2, %v3182_v20 }
 0x3e0   : > { %3188 = vmatmul.msk.f32.gmra.mxu2 %vm515_vm2, %v3182_v20 }
 0x3e1   : > { %3191 = vmatmul.msk.f32.gmra.mxu3 %vm515_vm2, %v3182_v20 }
 0x3e2   : > { %v1795_v30 = vpop.f32.mrf.mxu3 }
 0x3e3   : > { %3195 = vmatmul.msk.f32.vlgmr.msrb.gmra.mxu0 %vm515_vm2, %v3192_v9  ;;  %3198 = vmatmul.msk.f32.vlgmr.msrb.gmra.mxu1 %vm515_vm2, %v3192_v9 }
 0x3e6   : > { %v1815_v13 = vpop.f32.mrf.mxu0  ;;  %v1841_v63 = vpop.f32.mrf.mxu1 }
 0x3e8   : > { %3201 = vmatmul.msk.f32.vlgmr.msra.gmra.mxu2 %vm515_vm2, %v3192_v9 }
 0x3e9   : > { %3207 = vmatmul.msk.f32.vlgmr.msra.gmra.mxu3 %vm515_vm2, %v3204_v12 }
 0x3eb   : > { %3196 = vmatmul.msk.f32.gmra.mxu0 %vm515_vm2, %v3193_v16  ;;  %3199 = vmatmul.msk.f32.gmra.mxu1 %vm515_vm2, %v3193_v16 }
 0x3ef   : > { %v1818_v8 = vpop.f32.mrf.mxu0  ;;  %v1844_v25 = vpop.f32.mrf.mxu1 }
 0x3f0   : > { %3202 = vmatmul.msk.f32.gmra.mxu2 %vm515_vm2, %v3193_v16 }
 0x3f1   : > { %3208 = vmatmul.msk.f32.gmra.mxu3 %vm515_vm2, %v3205_v17 }
 0x3f2   : > { %v1904_v31 = vpop.f32.mrf.mxu2 }
 0x3f3   : > { %3197 = vmatmul.msk.f32.gmra.mxu0 %vm515_vm2, %v3194_v14  ;;  %3200 = vmatmul.msk.f32.gmra.mxu1 %vm515_vm2, %v3194_v14  ;;  %v1905_v10 = vadd.f32 %v1904_v31, %v1789_v34  ;;  %v1930_v35 = vpop.f32.mrf.mxu3 }
 0x3f4   : > { %v1931_v40 = vadd.f32 %v1930_v35, %v1815_v13 }
 0x3f7   : > { %v1821_v36 = vpop.f32.mrf.mxu0 }
 0x3f8   : > { %v1847_v37 = vpop.f32.mrf.mxu1  ;;  %3203 = vmatmul.msk.f32.gmra.mxu2 %vm515_vm2, %v3194_v14 }
 0x3f9   : > { %3209 = vmatmul.msk.f32.gmra.mxu3 %vm515_vm2, %v3206_v45 }
 0x3fa   : > { %v1907_v44 = vpop.f32.mrf.mxu2 }
 0x3fb   : > { %3210 = vmatmul.msk.f32.vlgmr.msra.gmra.mxu0 %vm515_vm2, %v3204_v12  ;;  %3213 = vmatmul.msk.f32.vlgmr.msra.gmra.mxu1 %vm515_vm2, %v3204_v12  ;;  %v1908_v22 = vadd.f32 %v1907_v44, %v1792_v11  ;;  %v1933_v33 = vpop.f32.mrf.mxu3 }
 0x3fc   : > { %v1934_v26 = vadd.f32 %v1933_v33, %v1818_v8 }
 0x3ff   : > { %v1956_v28 = vpop.f32.mrf.mxu0 }
 0x400   : > { %v1957_v23 = vadd.f32 %v1956_v28, %v1841_v63  ;;  %v2023_v39 = vpop.f32.mrf.mxu1 }
 0x401   : > { %v2084_v42 = vadd.f32 %v2023_v39, %v1905_v10 }
 0x402   : > { %v1910_v43 = vpop.f32.mrf.mxu2 }
 0x403   : > { %3211 = vmatmul.msk.f32.gmra.mxu0 %vm515_vm2, %v3205_v17  ;;  %3214 = vmatmul.msk.f32.gmra.mxu1 %vm515_vm2, %v3205_v17  ;;  %v1911_v21 = vadd.f32 %v1910_v43, %v1795_v30 }
 0x404   : > { %v1936_v46 = vpop.f32.mrf.mxu3 }
 0x405   : > { %v1937_v48 = vadd.f32 %v1936_v46, %v1821_v36 }
 0x408   : > { %v1959_v52 = vpop.f32.mrf.mxu0  ;;  %v2026_v47 = vpop.f32.mrf.mxu1 }
 0x409   : > { %v1960_v32 = vadd.f32 %v1959_v52, %v1844_v25  ;;  %v2087_v24 = vadd.f32 %v2026_v47, %v1908_v22 }
 0x40b   : > { %3212 = vmatmul.msk.f32.gmra.mxu0 %vm515_vm2, %v3206_v45  ;;  %3215 = vmatmul.msk.f32.gmra.mxu1 %vm515_vm2, %v3206_v45  ;;  %v2049_v41 = vpop.f32.mrf.mxu2 }
 0x40c   : > { %v2075_v38 = vpop.f32.mrf.mxu3  ;;  %v2085_v51 = vadd.f32 %v2049_v41, %v1931_v40 }
 0x40d   : > { %v2086_v53 = vadd.f32 %v2075_v38, %v1957_v23 }
 0x410   : > { %v1962_v54 = vpop.f32.mrf.mxu0  ;;  %v2029_v57 = vpop.f32.mrf.mxu1 }
 0x411   : > { %v1963_v5 = vadd.f32 %v1962_v54, %v1847_v37  ;;  %v2090_v59 = vadd.f32 %v2029_v57, %v1911_v21 }
 0x413   : > { %v2052_v60 = vpop.f32.mrf.mxu2 }
 0x414   : > { %v2078_v55 = vpop.f32.mrf.mxu3  ;;  %v2088_v50 = vadd.f32 %v2052_v60, %v1934_v26 }
 0x415   : > { %v2089_v49 = vadd.f32 %v2078_v55, %v1960_v32 }
 0x418   : > { %v2151_v62 = vpop.f32.mrf.mxu0  ;;  %v2177_v58 = vpop.f32.mrf.mxu1 }
 0x419   : > { %v2212_v56 = vadd.f32 %v2151_v62, %v2084_v42  ;;  %v2213_v27 = vadd.f32 %v2177_v58, %v2085_v51 }
 0x41b   : > { %v2055_v7 = vpop.f32.mrf.mxu2 }
 0x41c   : > { %v2081_v61 = vpop.f32.mrf.mxu3  ;;  %v2091_v2 = vadd.f32 %v2055_v7, %v1937_v48  ;;  %v2850_v7 = vld [vmem:[#allocation3] sm:$0x1] }
 0x41d   : > { %v2092_v3 = vadd.f32 %v2081_v61, %v1963_v5  ;;  %v3580_v61 = vmov 0  }
 0x41e   : > { %3561 = vset.pattern.permute.xlu1 %v3580_v61  ;;  %3562 = vset.pattern.permute.xlu0 %v3580_v61 }
 0x41f   : > { %2853 = vperm.xlu1 %3561, %v2850_v7  }
 0x420   : > { %v2154_v15 = vpop.f32.mrf.mxu0  ;;  %v2180_v18 = vpop.f32.mrf.mxu1 }
 0x421   : > { %v2215_v4 = vadd.f32 %v2154_v15, %v2087_v24  ;;  %v2216_v6 = vadd.f32 %v2180_v18, %v2088_v50 }
 0x423   : > { %v2203_v19 = vpop.f32.mrf.mxu2 }
 0x424   : > { %v2251_v0 = vpop.f32.mrf.mxu3  ;;  %v2214_v29 = vadd.f32 %v2203_v19, %v2086_v53 }
 0x425   : > { %v4485_v1 = vadd.f32 %v2251_v0, %v2212_v56 }
 0x428   : > { %v2157_v34 = vpop.f32.mrf.mxu0  ;;  %v2183_v9 = vpop.f32.mrf.mxu1 }
 0x429   : > { %v2218_v20 = vadd.f32 %v2157_v34, %v2090_v59  ;;  %v2219_v11 = vadd.f32 %v2183_v9, %v2091_v2 }
 0x42b   : > { %v2206_v12 = vpop.f32.mrf.mxu2 }
 0x42c   : > { %v2254_v13 = vpop.f32.mrf.mxu3  ;;  %v2217_v63 = vadd.f32 %v2206_v12, %v2089_v49 }
 0x42d   : > { %v2315_v16 = vadd.f32 %v2254_v13, %v2215_v4 }
 0x430   : > { %v2277_v30 = vpop.f32.mrf.mxu0  ;;  %v2303_v8 = vpop.f32.mrf.mxu1 }
 0x431   : > { %v2313_v17 = vadd.f32 %v2277_v30, %v2213_v27  ;;  %v4487_v25 = vadd.f32 %v2303_v8, %v2214_v29 }
 0x433   : > { %v2209_v14 = vpop.f32.mrf.mxu2 }
 0x434   : > { %v2257_v31 = vpop.f32.mrf.mxu3  ;;  %v2220_v10 = vadd.f32 %v2209_v14, %v2092_v3 }
 0x435   : > { %v2318_v35 = vadd.f32 %v2257_v31, %v2218_v20 }
 0x438   : > { %v2280_v40 = vpop.f32.mrf.mxu0  ;;  %v2306_v36 = vpop.f32.mrf.mxu1 }
 0x439   : > { %v2316_v45 = vadd.f32 %v2280_v40, %v2216_v6  ;;  %v4489_v37 = vadd.f32 %v2306_v36, %v2217_v63 }
 0x43b   : > { %v2395_v44 = vpop.f32.mrf.mxu2 }
 0x43c   : > { %v2421_v22 = vpop.f32.mrf.mxu3  ;;  %v2456_v19 = vadd.f32 %v2395_v44, %v4485_v1 }
 0x43d   : > { %v4491_v33 = vadd.f32 %v2421_v22, %v2313_v17 }
 0x440   : > { %v2283_v26 = vpop.f32.mrf.mxu0  ;;  %v2309_v23 = vpop.f32.mrf.mxu1 }
 0x441   : > { %v2319_v28 = vadd.f32 %v2283_v26, %v2219_v11  ;;  %v2320_v39 = vadd.f32 %v2309_v23, %v2220_v10 }
 0x443   : > { %v2398_v42 = vpop.f32.mrf.mxu2 }
 0x444   : > { %v2424_v43 = vpop.f32.mrf.mxu3  ;;  %v2459_v4 = vadd.f32 %v2398_v42, %v2315_v16  ;;  %v2849_v16 = vld [vmem:[%s4518_s8] sm:$0x1] }
 0x445   : > { %v2460_v21 = vadd.f32 %v2424_v43, %v2316_v45 }
 0x448   : > { %v2447_v46 = vpop.f32.mrf.mxu0  ;;  %v2523_v48 = vpop.f32.mrf.mxu1 }
 0x449   : > { %v2584_v9 = vadd.f32 %v2523_v48, %v2456_v19  ;;  %v2458_v44 = vadd.f32 %v2447_v46, %v4487_v25 }
 0x44b   : > { %v2401_v52 = vpop.f32.mrf.mxu2 }
 0x44c   : > { %v2427_v32 = vpop.f32.mrf.mxu3  ;;  %v2462_v3 = vadd.f32 %v2401_v52, %v2318_v35 }
 0x44d   : > { %v2463_v14 = vadd.f32 %v2427_v32, %v2319_v28 }
 0x450   : > { %v2450_v47 = vpop.f32.mrf.mxu0  ;;  %v2526_v24 = vpop.f32.mrf.mxu1 }
 0x451   : > { %v2587_v0 = vadd.f32 %v2526_v24, %v2459_v4  ;;  %v2461_v35 = vadd.f32 %v2450_v47, %v4489_v37 }
 0x453   : > { %v2549_v41 = vpop.f32.mrf.mxu2 }
 0x454   : > { %v2575_v38 = vpop.f32.mrf.mxu3  ;;  %v2585_v42 = vadd.f32 %v2549_v41, %v4491_v33 }
 0x458   : > { %v2453_v51 = vpop.f32.mrf.mxu0  ;;  %v2529_v53 = vpop.f32.mrf.mxu1 }
 0x459   : > { %v2590_v18 = vadd.f32 %v2529_v53, %v2462_v3  ;;  %v2464_v1 = vadd.f32 %v2453_v51, %v2320_v39  ;;  %v2586_v39 = vadd.f32 %v2575_v38, %v2458_v44  ;;  %v2930_v53 = vlaneseq }
 0x45b   : > { %v2552_v5 = vpop.f32.mrf.mxu2  ;;  %vm2932_vm12 = vcmp.lt.s32.totalorder %v2930_v53, 384 }
 0x45c   : > { %v2578_v54 = vpop.f32.mrf.mxu3  ;;  %v2588_v45 = vadd.f32 %v2552_v5, %v2460_v21 }
 0x45d   : > { %v2589_v22 = vadd.f32 %v2578_v54, %v2461_v35 }
 0x460   : > { %v2651_v57 = vpop.f32.mrf.mxu0  ;;  %v2677_v59 = vpop.f32.mrf.mxu1 }
 0x461   : > { %v2712_v13 = vadd.f32 %v2651_v57, %v2584_v9  ;;  %v2713_v24 = vadd.f32 %v2677_v59, %v2585_v42 }
 0x463   : > { %v2555_v55 = vpop.f32.mrf.mxu2 }
 0x464   : > { %v2581_v60 = vpop.f32.mrf.mxu3  ;;  %v2591_v31 = vadd.f32 %v2555_v55, %v2463_v14 }
 0x465   : > { %v2592_v40 = vadd.f32 %v2581_v60, %v2464_v1 }
 0x468   : > { %v2654_v50 = vpop.f32.mrf.mxu0  ;;  %v2680_v49 = vpop.f32.mrf.mxu1 }
 0x469   : > { %v2715_v11 = vadd.f32 %v2654_v50, %v2587_v0  ;;  %v2716_v43 = vadd.f32 %v2680_v49, %v2588_v45 }
 0x46b   : > { %v2703_v58 = vpop.f32.mrf.mxu2 }
 0x46c   : > { %v2779_v62 = vpop.f32.mrf.mxu3  ;;  %v2714_v37 = vadd.f32 %v2703_v58, %v2586_v39 }
 0x46d   : > { %v2840_v17 = vadd.f32 %v2779_v62, %v2712_v13 }
 0x470   : > { %v2657_v56 = vpop.f32.mrf.mxu0  ;;  %v2683_v27 = vpop.f32.mrf.mxu1 }
 0x471   : > { %v2718_v29 = vadd.f32 %v2657_v56, %v2590_v18  ;;  %v2719_v36 = vadd.f32 %v2683_v27, %v2591_v31 }
 0x473   : > { %v2706_v34 = vpop.f32.mrf.mxu2 }
 0x474   : > { %v2782_v2 = vpop.f32.mrf.mxu3  ;;  %v2717_v52 = vadd.f32 %v2706_v34, %v2589_v22 }
 0x475   : > { %v2843_v63 = vadd.f32 %v2782_v2, %v2715_v11 }
 0x478   : > { %v2805_v15 = vpop.f32.mrf.mxu0  ;;  %v2831_v6 = vpop.f32.mrf.mxu1 }
 0x479   : > { %v2841_v47 = vadd.f32 %v2805_v15, %v2713_v24  ;;  %v2842_v25 = vadd.f32 %v2831_v6, %v2714_v37 }
 0x47b   : > { %v2709_v10 = vpop.f32.mrf.mxu2 }
 0x47c   : > { %v2785_v20 = vpop.f32.mrf.mxu3  ;;  %v2720_v26 = vadd.f32 %v2709_v10, %v2592_v40 }
 0x47d   : > { %v2846_v12 = vadd.f32 %v2785_v20, %v2718_v29 }
 0x47f   : > { %2873 = vmatpush.msrb.mxu2 %v2846_v12 }
 0x480   : > { %v2808_v30 = vpop.f32.mrf.mxu0  ;;  %v2834_v8 = vpop.f32.mrf.mxu1 }
 0x481   : > { %2874 = vmatpush.msrb.mxu2 %v2843_v63  ;;  %v2844_v51 = vadd.f32 %v2808_v30, %v2716_v43  ;;  %v2845_v21 = vadd.f32 %v2834_v8, %v2717_v52 }
 0x483   : > { %2875 = vmatpush.msrb.mxu2 %v2840_v17 }
 0x484   : > { %3216 = vmatmul.msk.f32.vlgmr.msrb.gmra.mxu2 %vm381_vm0, %v2849_v16 }
 0x488   : > { %v2811_v23 = vpop.f32.mrf.mxu0  ;;  %v2837_v48 = vpop.f32.mrf.mxu1 }
 0x489   : > { %v2847_v28 = vadd.f32 %v2811_v23, %v2719_v36  ;;  %v2848_v32 = vadd.f32 %v2837_v48, %v2720_v26 }
 0x48b   : > { %2893 = vmatpush.msra.mxu2 %v2847_v28  ;;  %2913 = vmatpush.msrb.mxu3 %v2848_v32 }
 0x48d   : > { %2894 = vmatpush.msra.mxu2 %v2844_v51  ;;  %2914 = vmatpush.msrb.mxu3 %v2845_v21 }
 0x48f   : > { %2895 = vmatpush.msra.mxu2 %v2841_v47  ;;  %2915 = vmatpush.msrb.mxu3 %v2842_v25 }
 0x490   : > { %3217 = vmatmul.msk.f32.vlgmr.msra.gmra.mxu2 %vm381_vm0, %v2849_v16  ;;  %3218 = vmatmul.msk.f32.vlgmr.msrb.gmra.mxu3 %vm381_vm0, %v2849_v16 }
 0x491   : > { %v2854_v46 = vpop.permute.xlu1 %2853 }
 0x492   : > { %v2856_v41 = vperm.slane %v2854_v46, 0 }
 0x507   : > { %v2877_v33 = vpop.f32.mrf.mxu2 }
 0x508   : > { %v2878_v59 = vadd.f32 %v2877_v33, %v2856_v41 }
 0x513   : > { %v2897_v38 = vpop.f32.mrf.mxu2  ;;  %v2917_v5 = vpop.f32.mrf.mxu3 }
 0x514   : > { %v2898_v54 = vadd.f32 %v2897_v38, %v2856_v41  ;;  %v2918_v57 = vadd.f32 %v2917_v5, %v2856_v41 }
 0x516   : > { %v2923_v60 = vrot.slane %v2898_v54, 7  ;;  %v2924_v55 = vrot.slane %v2918_v57, 6 }
 0x518   : > { %v2926_v50 = vsel %vm2925_vm10, %v2878_v59, %v2923_v60 }
 0x519   : > { %v2928_v49 = vsel %vm2927_vm11, %v2926_v50, %v2924_v55 }
 0x51a   : > { %2934 = vst.msk [vmem:[%s359_s19] sm:$0x7] %vm2932_vm12, %v2928_v49 }
 0x51b PF: > { %s22_s15 = sadd.s32 1, %s3569_s15  }
 0x51c   : > { %p19_p4 = scmp.ge.s32.totalorder %s22_s15, 4  }
 0x51e   :  { %21 = sbr.rel (!%p19_p4) target bundleno = 3 (0x3), region = 106 }

</bundles_post_ra>
